<compile_context>
chip_gen: v7x
topology: tpu7x:2x2x1
jax: 0.10.0
libtpu: 0.0.40
codegen_flags: <defaults>
</compile_context>

<pallas_src>
import functools
import math

import jax
import jax.numpy as jnp
from jax import lax
from jax.experimental import pallas as pl
from jax.experimental.pallas import tpu as pltpu


def _round_up(n, m):
    return ((n + m - 1) // m) * m


def _gelu(h):
    # tanh-approximation GELU (VPU + EUP only). The base model is generic; the kernel and the
    # in-file reference use the same variant so the correctness check is self-consistent.
    # TODO(synk): PyTorch's default nn.GELU is erf-based; swap in jax.scipy erf if bit parity with
    # a specific torch base model matters.
    c = 0.7978845608028654  # sqrt(2/pi)
    return 0.5 * h * (1.0 + jnp.tanh(c * (h + 0.044715 * h * h * h)))


def _clip_norm(v, max_norm):
    # clip_and_log's norm clipping: v * min(1, max_norm / ||v||_2) along the last dim.
    # rsqrt lowers to the EUP (its own bundle slot); rsqrt(0)=inf -> factor clamps to 1.
    sq = jnp.sum(v * v, axis=-1, keepdims=True)
    factor = jnp.minimum(max_norm * lax.rsqrt(sq), 1.0)
    return v * factor


def cancel_drift_kernel(t_ref, x_ref, w1t_ref, w1x_ref, b1_ref, w2_ref, b2_ref,
                        mu_ref, ivar_ref, o_ref, *,
                        drift_coeff, inv_diff, score_scale, clip_model, clip_score,
                        bf16_epilogue):
    t = t_ref[...]                       # [TB, 1]  f32
    x = x_ref[...]                       # [TB, D]  f32

    # --- base_model(t, x): 2-layer MLP, bf16 MXU operands, f32 accumulation ----------
    h = jnp.dot(x.astype(jnp.bfloat16), w1x_ref[...],
                preferred_element_type=jnp.float32)           # [TB, H] f32
    h = h + t * w1t_ref[...] + b1_ref[...]                    # f32 bias/time add
    if bf16_epilogue:
        # v6e/v7x: bf16-native VPU/EUP -> run GELU in bf16, feed the MXU directly.
        h = _gelu(h.astype(jnp.bfloat16))
    else:
        # v5e and older: no bf16 VALU/EUP -> GELU in f32, cast only for the MXU.
        h = _gelu(h).astype(jnp.bfloat16)
    ctrl = jnp.dot(h, w2_ref[...], preferred_element_type=jnp.float32)   # [TB, D] f32
    ctrl = ctrl + b2_ref[...]

    # --- clipped_base_model: clip_and_log norm clipping (logging is host-side only) --
    if clip_model is not None:
        ctrl = _clip_norm(ctrl, clip_model)

    # --- clipped_target_score: Gaussian target, score(x) = (mu - x) * inv_var --------
    score = (mu_ref[...] - x) * ivar_ref[...]
    if clip_score is not None:
        score = _clip_norm(score, clip_score)

    # --- ctrl + (scale * score - sde.drift(t, x)) / sde.diff(t, x) -------------------
    # OU sde: drift = drift_coeff * x, diff = diff_coeff (constant); 1/diff is folded
    # into the compile-time constant inv_diff.
    out = ctrl + (score_scale * score - drift_coeff * x) * inv_diff
    o_ref[...] = out.astype(o_ref.dtype)


def cancel_drift_ctrl_forward(t, x, params, *,
                              drift_coeff=-1.0, diff_coeff=math.sqrt(2.0),
                              scale_score=1.0, langevin_init=False,
                              clip_model=None, clip_score=None,
                              tb=512, bf16_epilogue=None, out_dtype=jnp.float32):
    """t: [B, 1] f32, x: [B, D] f32 -> [B, D] out_dtype (CancelDriftCtrl.forward)."""
    B, D = x.shape
    H = params["w1x"].shape[1]
    assert t.shape == (B, 1)

    # bf16 GELU/epilogue only on chips with bf16 VPU/EUP (v6e / v7x). Overridable.
    if bf16_epilogue is None:
        kind = jax.devices()[0].device_kind.lower()
        bf16_epilogue = not any(v in kind for v in ("v2", "v3", "v4", "v5"))

    # Batch tile: large enough to amortize the ~0.35 us per-grid-step overhead and keep the
    # MXU streaming, but capped so the 1-D grid has >=2 steps whenever the batch allows it
    # (lets dimension_semantics=("parallel",) shard steps across both v7x TensorCores).
    tb = max(8, min(int(tb), _round_up(B, 8)))
    tb = _round_up(tb, 8)
    if B >= 16:
        tb = min(tb, _round_up(pl.cdiv(B, 2), 8))
    grid = (pl.cdiv(B, tb),)
    # No wrapper-side zero-pad: ragged tails use Pallas OOB block semantics (padded reads,
    # discarded writes); every op in the kernel is row-wise, so OOB rows never contaminate
    # in-bounds rows.

    # bf16 weights for the MXU (halves weight HBM traffic); biases / score params stay f32.
    w1x = params["w1x"].astype(jnp.bfloat16)
    w2 = params["w2"].astype(jnp.bfloat16)
    w1t, b1, b2 = params["w1t"], params["b1"], params["b2"]
    mu, inv_var = params["mu"], params["inv_var"]

    score_scale = (float(diff_coeff) ** 2) / 2.0 if langevin_init else float(scale_score)
    kernel = functools.partial(
        cancel_drift_kernel,
        drift_coeff=float(drift_coeff), inv_diff=1.0 / float(diff_coeff),
        score_scale=score_scale, clip_model=clip_model, clip_score=clip_score,
        bf16_epilogue=bool(bf16_epilogue))

    out_bytes_per_elem = jnp.dtype(out_dtype).itemsize
    flops = 2 * B * (D * H + H * D) + 16 * B * (D + H)
    bytes_accessed = (t.size * 4 + x.size * 4 + B * D * out_bytes_per_elem
                      + w1x.size * 2 + w2.size * 2
                      + (w1t.size + b1.size + b2.size + mu.size + inv_var.size) * 4)
    cost = pl.CostEstimate(flops=int(flops), transcendentals=int(B * H),
                           bytes_accessed=int(bytes_accessed))

    const = lambda shape: pl.BlockSpec(shape, lambda i: (0, 0))  # grid-invariant: DMA'd once

    return pl.pallas_call(
        kernel,
        out_shape=jax.ShapeDtypeStruct((B, D), out_dtype),
        grid_spec=pltpu.PrefetchScalarGridSpec(
            num_scalar_prefetch=0,
            grid=grid,
            in_specs=[
                pl.BlockSpec((tb, 1), lambda i: (i, 0)),   # t tile
                pl.BlockSpec((tb, D), lambda i: (i, 0)),   # x tile
                const((1, H)),                             # W1_t (time column)
                const((D, H)),                             # W1_x (bf16)
                const((1, H)),                             # b1
                const((H, D)),                             # W2   (bf16)
                const((1, D)),                             # b2
                const((1, D)),                             # target mean
                const((1, D)),                             # target inverse variance
            ],
            out_specs=pl.BlockSpec((tb, D), lambda i: (i, 0)),
        ),
        compiler_params=pltpu.CompilerParams(
            dimension_semantics=("parallel",),
        ),
        cost_estimate=cost,
    )(t, x, w1t, w1x, b1, w2, b2, mu, inv_var)


def init_params(key, d, h):
    k1, k2, k3, k4, k5 = jax.random.split(key, 5)
    s_in = 1.0 / math.sqrt(d + 1.0)
    s_hid = 1.0 / math.sqrt(float(h))
    return {
        "w1t": jax.random.normal(k1, (1, h), jnp.float32) * s_in,
        "w1x": jax.random.normal(k2, (d, h), jnp.float32) * s_in,
        "b1": jnp.zeros((1, h), jnp.float32),
        "w2": jax.random.normal(k3, (h, d), jnp.float32) * s_hid,
        "b2": jnp.zeros((1, d), jnp.float32),
        # Gaussian target distribution for target_score: score(x) = (mu - x) * inv_var.
        "mu": 0.1 * jax.random.normal(k4, (1, d), jnp.float32),
        "inv_var": jax.random.uniform(k5, (1, d), jnp.float32, minval=0.5, maxval=2.0),
    }


def reference_forward(t, x, params, *,
                      drift_coeff=-1.0, diff_coeff=math.sqrt(2.0),
                      scale_score=1.0, langevin_init=False,
                      clip_model=None, clip_score=None):
    # Pure-JAX all-f32 reference matching CancelDriftCtrl.forward semantics.
    h = x @ params["w1x"] + t * params["w1t"] + params["b1"]
    ctrl = _gelu(h) @ params["w2"] + params["b2"]
    if clip_model is not None:
        ctrl = _clip_norm(ctrl, clip_model)
    score = (params["mu"] - x) * params["inv_var"]
    if clip_score is not None:
        score = _clip_norm(score, clip_score)
    scale = (float(diff_coeff) ** 2) / 2.0 if langevin_init else float(scale_score)
    drift = drift_coeff * x
    return ctrl + (scale * score - drift) / diff_coeff


if __name__ == "__main__":
    # Lane-dense feature dims (multiples of 128). With B=256 the tile cap gives tb=128 and a
    # 2-step grid, so output stores are unmasked and both v7x TensorCores get work.
    B, D, H = 256, 128, 256
    key = jax.random.PRNGKey(0)
    kp, kx, kt = jax.random.split(key, 3)

    params = init_params(kp, D, H)
    x = jax.random.normal(kx, (B, D), jnp.float32)
    t = jax.random.uniform(kt, (B, 1), jnp.float32, minval=0.0, maxval=1.0)

    cfg = dict(drift_coeff=-1.0, diff_coeff=math.sqrt(2.0), scale_score=1.0,
               langevin_init=False, clip_model=4.0, clip_score=8.0)

    out = cancel_drift_ctrl_forward(t, x, params, **cfg)
    out = jax.block_until_ready(out)

    ref = reference_forward(t, x, params, **cfg)
    assert out.shape == (B, D)
    # bf16 matmul operands / bf16 GELU epilogue (f32 accumulation) vs the all-f32 reference:
    # check elementwise tolerance plus an overall relative-error norm.
    max_err = float(jnp.max(jnp.abs(out - ref)))
    rel_err = float(jnp.linalg.norm(out - ref) / jnp.linalg.norm(ref))
    assert jnp.allclose(out, ref, atol=1e-1, rtol=1e-1), f"mismatch vs reference (max|err|={max_err})"
    assert rel_err < 5e-2, f"relative error too large: {rel_err}"

    # TODO(synk): clip_and_log's metric-logging side-effect and the optional score_model branch
    # (ScoreCtrl default score_model=None) are host-side / unused and intentionally omitted.
    print("KERNEL_OK")
</pallas_src>

<mosaic_0001>
module attributes {stable_mosaic.version = 11 : i64} {
  func.func @cancel_drift_kernel(%arg0: i32, %arg1: memref<128x1xf32, #tpu.memory_space<vmem>>, %arg2: memref<128x128xf32, #tpu.memory_space<vmem>>, %arg3: memref<1x256xf32, #tpu.memory_space<vmem>>, %arg4: memref<128x256xbf16, #tpu.memory_space<vmem>>, %arg5: memref<1x256xf32, #tpu.memory_space<vmem>>, %arg6: memref<256x128xbf16, #tpu.memory_space<vmem>>, %arg7: memref<1x128xf32, #tpu.memory_space<vmem>>, %arg8: memref<1x128xf32, #tpu.memory_space<vmem>>, %arg9: memref<1x128xf32, #tpu.memory_space<vmem>>, %arg10: memref<128x128xf32, #tpu.memory_space<vmem>>) attributes {dimension_semantics = [#tpu.dimension_semantics<parallel>], iteration_bounds = array<i64: 2>, scalar_prefetch = 0 : i64, scratch_operands = 0 : i64, tpu.core_type = #tpu.core_type<tc>, window_params = [{transform_indices = @transform_0, window_bounds = array<i64: 128, 1>}, {transform_indices = @transform_1, window_bounds = array<i64: 128, 128>}, {pipeline_mode = #tpu.pipeline_mode<synchronous>, transform_indices = @transform_2, window_bounds = array<i64: 1, 256>}, {pipeline_mode = #tpu.pipeline_mode<synchronous>, transform_indices = @transform_3, window_bounds = array<i64: 128, 256>}, {pipeline_mode = #tpu.pipeline_mode<synchronous>, transform_indices = @transform_4, window_bounds = array<i64: 1, 256>}, {pipeline_mode = #tpu.pipeline_mode<synchronous>, transform_indices = @transform_5, window_bounds = array<i64: 256, 128>}, {pipeline_mode = #tpu.pipeline_mode<synchronous>, transform_indices = @transform_6, window_bounds = array<i64: 1, 128>}, {pipeline_mode = #tpu.pipeline_mode<synchronous>, transform_indices = @transform_7, window_bounds = array<i64: 1, 128>}, {pipeline_mode = #tpu.pipeline_mode<synchronous>, transform_indices = @transform_8, window_bounds = array<i64: 1, 128>}, {transform_indices = @transform_9, window_bounds = array<i64: 128, 128>}]} {
    %c0 = arith.constant 0 : index
    %c0_0 = arith.constant 0 : index
    %0 = vector.load %arg1[%c0, %c0_0] : memref<128x1xf32, #tpu.memory_space<vmem>>, vector<128x1xf32>
    %c0_1 = arith.constant 0 : index
    %c0_2 = arith.constant 0 : index
    %1 = vector.load %arg2[%c0_1, %c0_2] : memref<128x128xf32, #tpu.memory_space<vmem>>, vector<128x128xf32>
    %2 = arith.truncf %1 : vector<128x128xf32> to vector<128x128xbf16>
    %c0_3 = arith.constant 0 : index
    %c0_4 = arith.constant 0 : index
    %3 = vector.load %arg4[%c0_3, %c0_4] : memref<128x256xbf16, #tpu.memory_space<vmem>>, vector<128x256xbf16>
    %cst = arith.constant dense<0.000000e+00> : vector<128x256xf32>
    %4 = tpu.matmul %2, %3, %cst {dimension_numbers = #tpu.dot_dimension_numbers<[1], [0], [0], [1], [0, 0, 1, 1], [], []>} : vector<128x128xbf16>, vector<128x256xbf16>, vector<128x256xf32> -> vector<128x256xf32>
    %c0_5 = arith.constant 0 : index
    %c0_6 = arith.constant 0 : index
    %5 = vector.load %arg3[%c0_5, %c0_6] : memref<1x256xf32, #tpu.memory_space<vmem>>, vector<1x256xf32>
    %6 = vector.broadcast %0 : vector<128x1xf32> to vector<128x256xf32>
    %7 = vector.broadcast %5 : vector<1x256xf32> to vector<128x256xf32>
    %8 = arith.mulf %6, %7 : vector<128x256xf32>
    %9 = arith.addf %4, %8 : vector<128x256xf32>
    %c0_7 = arith.constant 0 : index
    %c0_8 = arith.constant 0 : index
    %10 = vector.load %arg5[%c0_7, %c0_8] : memref<1x256xf32, #tpu.memory_space<vmem>>, vector<1x256xf32>
    %11 = vector.broadcast %10 : vector<1x256xf32> to vector<128x256xf32>
    %12 = arith.addf %9, %11 : vector<128x256xf32>
    %13 = arith.truncf %12 : vector<128x256xf32> to vector<128x256xbf16>
    %cst_9 = arith.constant 5.000000e-01 : bf16
    %14 = vector.broadcast %cst_9 : bf16 to vector<128x256xbf16>
    %15 = arith.mulf %14, %13 : vector<128x256xbf16>
    %cst_10 = arith.constant 4.467770e-02 : bf16
    %16 = vector.broadcast %cst_10 : bf16 to vector<128x256xbf16>
    %17 = arith.mulf %16, %13 : vector<128x256xbf16>
    %18 = arith.mulf %17, %13 : vector<128x256xbf16>
    %19 = arith.mulf %18, %13 : vector<128x256xbf16>
    %20 = arith.addf %13, %19 : vector<128x256xbf16>
    %cst_11 = arith.constant 7.968750e-01 : bf16
    %21 = vector.broadcast %cst_11 : bf16 to vector<128x256xbf16>
    %22 = arith.mulf %21, %20 : vector<128x256xbf16>
    %23 = math.tanh %22 : vector<128x256xbf16>
    %cst_12 = arith.constant 1.000000e+00 : bf16
    %24 = vector.broadcast %cst_12 : bf16 to vector<128x256xbf16>
    %25 = arith.addf %24, %23 : vector<128x256xbf16>
    %26 = arith.mulf %15, %25 : vector<128x256xbf16>
    %c0_13 = arith.constant 0 : index
    %c0_14 = arith.constant 0 : index
    %27 = vector.load %arg6[%c0_13, %c0_14] : memref<256x128xbf16, #tpu.memory_space<vmem>>, vector<256x128xbf16>
    %cst_15 = arith.constant dense<0.000000e+00> : vector<128x128xf32>
    %28 = tpu.matmul %26, %27, %cst_15 {dimension_numbers = #tpu.dot_dimension_numbers<[1], [0], [0], [1], [0, 0, 1, 1], [], []>} : vector<128x256xbf16>, vector<256x128xbf16>, vector<128x128xf32> -> vector<128x128xf32>
    %c0_16 = arith.constant 0 : index
    %c0_17 = arith.constant 0 : index
    %29 = vector.load %arg7[%c0_16, %c0_17] : memref<1x128xf32, #tpu.memory_space<vmem>>, vector<1x128xf32>
    %30 = vector.broadcast %29 : vector<1x128xf32> to vector<128x128xf32>
    %31 = arith.addf %28, %30 : vector<128x128xf32>
    %32 = arith.mulf %31, %31 : vector<128x128xf32>
    %cst_18 = arith.constant dense<0.000000e+00> : vector<128xf32>
    %33 = vector.multi_reduction <add>, %32, %cst_18 [1] : vector<128x128xf32> to vector<128xf32>
    %34 = vector.shape_cast %33 : vector<128xf32> to vector<128x1xf32>
    %35 = math.rsqrt %34 : vector<128x1xf32>
    %cst_19 = arith.constant 4.000000e+00 : f32
    %36 = vector.broadcast %cst_19 : f32 to vector<128x1xf32>
    %37 = arith.mulf %36, %35 : vector<128x1xf32>
    %cst_20 = arith.constant 1.000000e+00 : f32
    %38 = vector.broadcast %cst_20 : f32 to vector<128x1xf32>
    %39 = arith.minimumf %37, %38 : vector<128x1xf32>
    %40 = vector.broadcast %39 : vector<128x1xf32> to vector<128x128xf32>
    %41 = arith.mulf %31, %40 : vector<128x128xf32>
    %c0_21 = arith.constant 0 : index
    %c0_22 = arith.constant 0 : index
    %42 = vector.load %arg8[%c0_21, %c0_22] : memref<1x128xf32, #tpu.memory_space<vmem>>, vector<1x128xf32>
    %43 = vector.broadcast %42 : vector<1x128xf32> to vector<128x128xf32>
    %44 = arith.subf %43, %1 : vector<128x128xf32>
    %c0_23 = arith.constant 0 : index
    %c0_24 = arith.constant 0 : index
    %45 = vector.load %arg9[%c0_23, %c0_24] : memref<1x128xf32, #tpu.memory_space<vmem>>, vector<1x128xf32>
    %46 = vector.broadcast %45 : vector<1x128xf32> to vector<128x128xf32>
    %47 = arith.mulf %44, %46 : vector<128x128xf32>
    %48 = arith.mulf %47, %47 : vector<128x128xf32>
    %cst_25 = arith.constant dense<0.000000e+00> : vector<128xf32>
    %49 = vector.multi_reduction <add>, %48, %cst_25 [1] : vector<128x128xf32> to vector<128xf32>
    %50 = vector.shape_cast %49 : vector<128xf32> to vector<128x1xf32>
    %51 = math.rsqrt %50 : vector<128x1xf32>
    %cst_26 = arith.constant 8.000000e+00 : f32
    %52 = vector.broadcast %cst_26 : f32 to vector<128x1xf32>
    %53 = arith.mulf %52, %51 : vector<128x1xf32>
    %cst_27 = arith.constant 1.000000e+00 : f32
    %54 = vector.broadcast %cst_27 : f32 to vector<128x1xf32>
    %55 = arith.minimumf %53, %54 : vector<128x1xf32>
    %56 = vector.broadcast %55 : vector<128x1xf32> to vector<128x128xf32>
    %57 = arith.mulf %47, %56 : vector<128x128xf32>
    %cst_28 = arith.constant 1.000000e+00 : f32
    %58 = vector.broadcast %cst_28 : f32 to vector<128x128xf32>
    %59 = arith.mulf %58, %57 : vector<128x128xf32>
    %cst_29 = arith.constant -1.000000e+00 : f32
    %60 = vector.broadcast %cst_29 : f32 to vector<128x128xf32>
    %61 = arith.mulf %60, %1 : vector<128x128xf32>
    %62 = arith.subf %59, %61 : vector<128x128xf32>
    %cst_30 = arith.constant 0.707106769 : f32
    %63 = vector.broadcast %cst_30 : f32 to vector<128x128xf32>
    %64 = arith.mulf %62, %63 : vector<128x128xf32>
    %65 = arith.addf %41, %64 : vector<128x128xf32>
    %c0_31 = arith.constant 0 : index
    %c0_32 = arith.constant 0 : index
    %66 = vector.load %arg10[%c0_31, %c0_32] : memref<128x128xf32, #tpu.memory_space<vmem>>, vector<128x128xf32>
    tpu.vector_store %arg10[%c0_31, %c0_32], %65 {strides = array<i32>} : memref<128x128xf32, #tpu.memory_space<vmem>>, vector<128x128xf32>,
    return
  }
  func.func @transform_0(%arg0: i32) -> (i32, i32) {
    %c0_i32 = arith.constant 0 : i32
    %c0_i32_0 = arith.constant 0 : i32
    return %arg0, %c0_i32 : i32, i32
  }
  func.func @transform_1(%arg0: i32) -> (i32, i32) {
    %c0_i32 = arith.constant 0 : i32
    %c0_i32_0 = arith.constant 0 : i32
    return %arg0, %c0_i32 : i32, i32
  }
  func.func @transform_2(%arg0: i32) -> (i32, i32) {
    %c0_i32 = arith.constant 0 : i32
    %c0_i32_0 = arith.constant 0 : i32
    %c0_i32_1 = arith.constant 0 : i32
    return %c0_i32, %c0_i32_0 : i32, i32
  }
  func.func @transform_3(%arg0: i32) -> (i32, i32) {
    %c0_i32 = arith.constant 0 : i32
    %c0_i32_0 = arith.constant 0 : i32
    %c0_i32_1 = arith.constant 0 : i32
    return %c0_i32, %c0_i32_0 : i32, i32
  }
  func.func @transform_4(%arg0: i32) -> (i32, i32) {
    %c0_i32 = arith.constant 0 : i32
    %c0_i32_0 = arith.constant 0 : i32
    %c0_i32_1 = arith.constant 0 : i32
    return %c0_i32, %c0_i32_0 : i32, i32
  }
  func.func @transform_5(%arg0: i32) -> (i32, i32) {
    %c0_i32 = arith.constant 0 : i32
    %c0_i32_0 = arith.constant 0 : i32
    %c0_i32_1 = arith.constant 0 : i32
    return %c0_i32, %c0_i32_0 : i32, i32
  }
  func.func @transform_6(%arg0: i32) -> (i32, i32) {
    %c0_i32 = arith.constant 0 : i32
    %c0_i32_0 = arith.constant 0 : i32
    %c0_i32_1 = arith.constant 0 : i32
    return %c0_i32, %c0_i32_0 : i32, i32
  }
  func.func @transform_7(%arg0: i32) -> (i32, i32) {
    %c0_i32 = arith.constant 0 : i32
    %c0_i32_0 = arith.constant 0 : i32
    %c0_i32_1 = arith.constant 0 : i32
    return %c0_i32, %c0_i32_0 : i32, i32
  }
  func.func @transform_8(%arg0: i32) -> (i32, i32) {
    %c0_i32 = arith.constant 0 : i32
    %c0_i32_0 = arith.constant 0 : i32
    %c0_i32_1 = arith.constant 0 : i32
    return %c0_i32, %c0_i32_0 : i32, i32
  }
  func.func @transform_9(%arg0: i32) -> (i32, i32) {
    %c0_i32 = arith.constant 0 : i32
    %c0_i32_0 = arith.constant 0 : i32
    return %arg0, %c0_i32 : i32, i32
  }
}

</mosaic_0001>

<bundles_post_ra>
// kernel: tpu_custom_call.1
= control target key start
LH: loop header
LB: loop body
LE: loop exit
PB: predicated region body
PF: predicated region fallthrough
CT: control target
= control target key end

     0   :  { %14 = vsyncpa [#allocation3], 0  ;;  %s2946_s0 = inlined_call_operand.vmem [shape: f32[256,1], index: 0, kind: input, shape index: {}]   ;;  %s2947_s1 = inlined_call_operand.vmem [shape: f32[256,128], index: 1, kind: input, shape index: {}]   ;;  %s2948_s2 = inlined_call_operand.vmem [shape: f32[1,256], index: 2, kind: input, shape index: {}]   ;;  %s2949_s3 = inlined_call_operand.hbm [shape: bf16[128,256], index: 3, kind: input, shape index: {}]   ;;  %s2950_s4 = inlined_call_operand.vmem [shape: f32[1,256], index: 4, kind: input, shape index: {}]   ;;  %s2951_s5 = inlined_call_operand.hbm [shape: bf16[256,128], index: 5, kind: input, shape index: {}]   ;;  %s2952_s6 = inlined_call_operand.vmem [shape: f32[1,128], index: 6, kind: input, shape index: {}]   ;;  %s2953_s7 = inlined_call_operand.vmem [shape: f32[1,128], index: 7, kind: input, shape index: {}]   ;;  %s2954_s8 = inlined_call_operand.vmem [shape: f32[1,128], index: 8, kind: input, shape index: {}]   ;;  %s2955_s9 = inlined_call_operand.hbm [shape: f32[256,128], index: 9, kind: output, shape index: {}]  }
   0x1   :  { %15 = vsyncpa [#allocation6], 0 }
   0x2   :  { %16 = vsyncpa [#allocation4], 0 }
   0x3   :  { %18 = vsyncpa [#allocation4 + $0x1], 0  ;;  %s2187_s30 = smov 0   ;;  %s2189_s10 = smov 0  }
   0x4   :  { %s2191_s11 = smov 0   ;;  %s2193_s12 = smov 0  }
   0x5 LB: > { %2962 = sst [smem:[#allocation11_spill]] %s2121_s11  ;;  %s2208_s13 = sadd.s32 4294967295, %s2125_s12   ;;  %s2125_s12 = sphi %s2193_s12, %s2976_s12   ;;  %s2121_s11 = sphi %s2191_s11, %s2978_s11   ;;  %s2117_s10 = sphi %s2189_s10, %s2980_s10   ;;  %s2113_s30 = sphi %s2187_s30, %s2979_s30  }
   0x6   : > { %s1660_s14 = sadd.s32 4294967294, %s2125_s12   ;;  %s2212_s15 = sadd.s32 1, %s2125_s12  }
   0x7   : > { %2963 = sst [smem:[#allocation12_spill]] %s2212_s15  ;;  %s230_s16 = sadd.s32 1, %s2121_s11 }
   0x8   : > { %s227_s17 = ssub.s32 %s2125_s12, %s2212_s15  ;;  %p240_p0 = scmp.ne.s32.totalorder %s2121_s11, %s2117_s10 }
   0x9   : > { %p228_p1 = scmp.eq.s32.totalorder %s227_s17, 0  ;;  %p241_p2 = scmp.eq.s32.totalorder %s2208_s13, 1 }
   0xa   : > { %p246_p3 = scmp.ne.s32.totalorder %s2117_s10, %s2113_s30  ;;  %p247_p4 = scmp.eq.s32.totalorder %s1660_s14, 1 }
   0xb   : > { %s2223_s18 = scalar_select %p228_p1, %s2121_s11, %s230_s16  }
   0xc   : > { %p2225_p5 = por %p241_p2, %p240_p0  ;;  %p2229_p6 = por %p247_p4, %p246_p3 }
   0xd   : > { %2964 = sst [smem:[#allocation13_spill]] %s2223_s18  ;;  %p1661_p7 = scmp.ge.s32.totalorder %s2125_s12, 1 }
   0xe   : > { %s2965_s19 = scalar_select %p2225_p5, 1, 0 }
   0xf   : > { %s2966_s20 = scalar_select %p2229_p6, 1, 0 }
  0x10   : > { %p254_p8 = scmp.lt.s32.totalorder %s2125_s12, 3  ;;  %p2956_p9 = scmp.eq.s32.totalorder %s2208_s13, 0 }
  0x11   : > { %s2127_s22 = smov [#allocation2]   ;;  %s2128_s25 = smov [#allocation5]  }
  0x12   : > { %p2236_p10 = pnand %p1661_p7, %p254_p8  ;;  %s269_s23 = sshll.u32 %s2127_s22, 4  ;;  %s270_s23 = int_to_ptr.vmem [resolvable:$true] %s269_s23 }
  0x13   : > { %s285_s26 = sshll.u32 %s2128_s25, 4  ;;  %s1999_s29 = scalar_lea.hbm %s2949_s3, 2048  ;;  %s2248_s26 = int_to_ptr.vmem [resolvable:$true] %s285_s26 }
  0x14   : > { %s2967_s21 = scalar_select %p2236_p10, 1, 0 }
  0x15   : > { %p1788_p11 = pneg %p2236_p10  ;;  %p2000_p13 = scmp.ne.s32.totalorder %s2949_s3, %s1999_s29 }
  0x16   : > { %p2006_p3 = scmp.lt.u32.totalorder %s1999_s29, %s2949_s3 }
  0x17   : > { %p2244_p12 = pnand %p2956_p9, %p1788_p11 }
  0x19   : > { %p2001_p0 = pneg %p2244_p12 }
  0x1b   : > { %p2002_p1 = pnand %p2001_p0, %p2000_p13 }
  0x1d   : > { %p2003_p2 = pneg %p2002_p1 }
  0x1f   : > { %p2008_p4 = pnand %p2006_p3, %p2003_p2 }
  0x21   : > { %2011 = shalt.err (!%p2008_p4)
}
  0x22   : > { %s2012_s25 = scalar_lea.vmem %s270_s23, 2048  ;;  %p2020_p9 = scmp.lt.s32.totalorder %s270_s23, %s270_s23 }
  0x23   : > { %p2013_p7 = scmp.ne.s32.totalorder %s270_s23, %s2012_s25  ;;  %p2021_p6 = scmp.lt.s32.totalorder %s2012_s25, %s2012_s25 }
  0x25   : > { %p2015_p8 = pnand %p2013_p7, %p2001_p0  ;;  %p2022_p5 = por %p2021_p6, %p2020_p9 }
  0x27   : > { %p2016_p11 = pneg %p2015_p8 }
  0x29   : > { %p2023_p10 = pnand %p2022_p5, %p2016_p11 }
  0x2b   : > { %2026 = shalt.err (!%p2023_p10)
}
  0x2c   : > { %s2129_s27 = smov 128   ;;  %s2130_s28 = smov 8  }
  0x2d   : > { %1791 = dma.hbm_to_vmem [thread:$0]  (!%p2244_p12), %s2949_s3, 2048, %s270_s23, [#allocation3], %s2129_s27, %s2129_s27, %s2130_s28  }
  0x2e   : > { %s2027_s22 = scalar_lea.hbm %s2951_s5, 2048 }
  0x2f   : > { %p2028_p13 = scmp.ne.s32.totalorder %s2951_s5, %s2027_s22  ;;  %p2034_p9 = scmp.lt.u32.totalorder %s2027_s22, %s2951_s5 }
  0x31   : > { %p2030_p5 = pnand %p2028_p13, %p2001_p0 }
  0x33   : > { %p2031_p6 = pneg %p2030_p5 }
  0x35   : > { %p2036_p10 = pnand %p2034_p9, %p2031_p6 }
  0x37   : > { %2039 = shalt.err (!%p2036_p10)
}
  0x38   : > { %s2040_s23 = scalar_lea.vmem %s2248_s26, 2048  ;;  %p2048_p4 = scmp.lt.s32.totalorder %s2248_s26, %s2248_s26 }
  0x39   : > { %p2041_p1 = scmp.ne.s32.totalorder %s2248_s26, %s2040_s23  ;;  %p2049_p7 = scmp.lt.s32.totalorder %s2040_s23, %s2040_s23 }
  0x3b   : > { %p2043_p2 = pnand %p2041_p1, %p2001_p0  ;;  %p2050_p8 = por %p2049_p7, %p2048_p4 }
  0x3d   : > { %p2044_p3 = pneg %p2043_p2 }
  0x3f   : > { %p2051_p11 = pnand %p2050_p8, %p2044_p3 }
  0x41   : > { %2054 = shalt.err (!%p2051_p11)
}
  0x42   : > { %s2131_s11 = smov 64   ;;  %s2132_s15 = smov 4  }
  0x43   : > { %1794 = dma.hbm_to_vmem [thread:$0]  (!%p2244_p12), %s2951_s5, 2048, %s2248_s26, [#allocation6], %s2131_s11, %s2131_s11, %s2132_s15  }
  0x44   : > { %p2969_p13 = scmp.ne.s32.totalorder %s2967_s21, 0 }
  0x45   : > { %p2970_p0 = scmp.eq.s32.totalorder (!%p2969_p13), %s2208_s13, 0 }
  0x46   : > { %328 = sbr.rel (%p2969_p13) target bundleno = 817 (0x331), region = 56 }
  0x4d   : > { %2100 = dma.done.wait (%p2970_p0), [#allocation3], 2048   ;;  %p2971_p5 = pmov %p2970_p0 }
  0x4e   : > { %p2972_p6 = pmov %p2970_p0 }
  0x4f   : > { %2102 = vsyncadd (%p2971_p5), [#allocation3], 4294965248 }
  0x50   : > { %2104 = dma.done.wait (%p2972_p6), [#allocation6], 2048   ;;  %p2973_p9 = pmov %p2970_p0 }
  0x51   : > { %v2133_v0 = vmov 0   ;;  %v1847_v1 = vld [vmem:[#allocation2 + $0x4] ss:$8 sps:$4 sm:$0xff]   ;;  %s1669_s21 = sshll.u32 %s2208_s13, 4  ;;  %v1849_v2 = vld [vmem:[#allocation2] ss:$8 sps:$4 sm:$0xff]  }
  0x52   : > { %2106 = vsyncadd (%p2973_p9), [#allocation6], 4294965248  ;;  %683 = vmatprep.mubr.bf16.mxu0 %v2133_v0  ;;  %1845 = vset.pattern.permute.xlu0 %v2133_v0  ;;  %v1850_v3 = vld [vmem:[#allocation2 + $0x14] ss:$8 sps:$4 sm:$0xff]   ;;  %v1852_v4 = vld [vmem:[#allocation2 + $0x10] ss:$8 sps:$4 sm:$0xff]  }
  0x53   : > { %1846 = vset.pattern.permute.xlu1 %v2133_v0  ;;  %651 = vmatprep.subr.bf16.mxu0 %v1847_v1  ;;  %p374_p12 = scmp.lt.s32.totalorder %s1669_s21, 31  ;;  %v1853_v5 = vld [vmem:[#allocation2 + $0x24] ss:$8 sps:$4 sm:$0xff]   ;;  %v1855_v6 = vld [vmem:[#allocation2 + $0x20] ss:$8 sps:$4 sm:$0xff]   ;;  %v1875_v61 = vld [vmem:[#allocation5 + $0x50] sm:$0xff]  }
  0x54   : > { %652 = vmatpush1.bf16.msra.mxu0 %v1849_v2  ;;  %v1856_v7 = vld [vmem:[#allocation2 + $0x34] ss:$8 sps:$4 sm:$0xff]   ;;  %v1858_v8 = vld [vmem:[#allocation2 + $0x30] ss:$8 sps:$4 sm:$0xff]   ;;  %v1859_v9 = vld [vmem:[#allocation2 + $0x44] ss:$8 sps:$4 sm:$0xff]  }
  0x55   : > { %653 = vmatprep.subr.bf16.mxu0 %v1850_v3  ;;  %s2982_s21 = smov (!%p374_p12, %s1669_s21), 31  ;;  %v1861_v10 = vld [vmem:[#allocation2 + $0x40] ss:$8 sps:$4 sm:$0xff]   ;;  %v1862_v12 = vld [vmem:[#allocation2 + $0x54] ss:$8 sps:$4 sm:$0xff]   ;;  %s370_s28 = sand.u32 1, %s2117_s10  }
  0x56   : > { %s1670_s24 = sshll.u32 %s2982_s21, 3  ;;  %v1864_v16 = vld [vmem:[#allocation2 + $0x50] ss:$8 sps:$4 sm:$0xff]   ;;  %v1865_v17 = vld [vmem:[#allocation2 + $0x64] ss:$8 sps:$4 sm:$0xff]   ;;  %s1713_s16 = sshll.u32 %s2208_s13, 11 }
  0x57   : > { %s2317_s29 = scalar_lea.vmem %s2946_s0, %s1670_s24  ;;  %v1867_v18 = vld [vmem:[#allocation2 + $0x60] ss:$8 sps:$4 sm:$0xff]   ;;  %v1868_v21 = vld [vmem:[#allocation2 + $0x74] ss:$8 sps:$4 sm:$0xff]   ;;  %s2328_s17 = scalar_lea.vmem %s2947_s1, %s1670_s24  ;;  %v1870_v24 = vld [vmem:[#allocation2 + $0x70] ss:$8 sps:$4 sm:$0xff]  }
  0x58   : > { %654 = vmatpush1.bf16.msra.mxu0 %v1852_v4  ;;  %v391_v11 = vld [vmem:[%s2317_s29] sm:$0xff]  ;;  %v393_v13 = vld [vmem:[%s2317_s29 + $0x10] sm:$0xff]  ;;  %v392_v14 = vld [vmem:[%s2317_s29 + $0x8] sm:$0xff]  ;;  %s2897_s23 = scalar_lea.hbm %s2955_s9, %s1713_s16  ;;  %s2905_s13 = scalar_lea.sflag [#allocation4], %s370_s28 }
  0x59   : > { %655 = vmatprep.subr.bf16.mxu0 %v1853_v5  ;;  %450 = vperm.xlu0 %1845, %v391_v11   ;;  %v394_v15 = vld [vmem:[%s2317_s29 + $0x18] sm:$0xff]  ;;  %v395_v19 = vld [vmem:[%s2317_s29 + $0x20] sm:$0xff]  ;;  %v396_v20 = vld [vmem:[%s2317_s29 + $0x28] sm:$0xff]  ;;  %p2974_p1 = scmp.ne.s32.totalorder %s2965_s19, 0  ;;  %s2134_s15 = smov [#allocation7]  }
  0x5a   : > { %460 = vperm.xlu1 %1846, %v393_v13   ;;  %v397_v22 = vld [vmem:[%s2317_s29 + $0x30] sm:$0xff]  ;;  %v398_v23 = vld [vmem:[%s2317_s29 + $0x38] sm:$0xff]  ;;  %v2333_v25 = vld [vmem:[%s2328_s17] sm:$0xff]  ;;  %s2059_s18 = sshll.u32 %s2134_s15, 4  ;;  %s2060_s18 = int_to_ptr.vmem [resolvable:$false] %s2059_s18 }
  0x5b   : > { %v2336_v26 = vld [vmem:[%s2328_s17 + $0x8] sm:$0xff]  ;;  %v399_v27 = vld [vmem:[%s2317_s29 + $0x40] sm:$0xff]  ;;  %v401_v30 = vld [vmem:[%s2317_s29 + $0x50] sm:$0xff]  ;;  %s2061_s27 = scalar_lea.vmem %s2060_s18, 4096 }
  0x5c   : > { %656 = vmatpush1.bf16.msra.mxu0 %v1855_v6  ;;  %v400_v28 = vld [vmem:[%s2317_s29 + $0x48] sm:$0xff]  ;;  %v423_v29 = vpack.c.bf16 %v2336_v26, %v2333_v25  ;;  %v402_v31 = vld [vmem:[%s2317_s29 + $0x58] sm:$0xff]  ;;  %v2346_v32 = vld [vmem:[%s2328_s17 + $0x10] sm:$0xff] }
  0x5d   : > { %657 = vmatprep.subr.bf16.mxu0 %v1856_v7  ;;  %455 = vperm.xlu0 %1845, %v392_v14   ;;  %v2349_v33 = vld [vmem:[%s2328_s17 + $0x18] sm:$0xff]  ;;  %v403_v34 = vld [vmem:[%s2317_s29 + $0x60] sm:$0xff]  ;;  %v404_v36 = vld [vmem:[%s2317_s29 + $0x68] sm:$0xff] }
  0x5e   : > { %465 = vperm.xlu1 %1846, %v394_v15   ;;  %v424_v35 = vpack.c.bf16 %v2349_v33, %v2346_v32  ;;  %v405_v37 = vld [vmem:[%s2317_s29 + $0x70] sm:$0xff]  ;;  %v406_v38 = vld [vmem:[%s2317_s29 + $0x78] sm:$0xff]  ;;  %v2359_v39 = vld [vmem:[%s2328_s17 + $0x20] sm:$0xff]  ;;  %s1668_s29 = sshll.u32 %s370_s28, 7 }
  0x5f   : > { %v2362_v40 = vld [vmem:[%s2328_s17 + $0x28] sm:$0xff]  ;;  %v2368_v42 = vld [vmem:[%s2328_s17 + $0x30] sm:$0xff]  ;;  %v2371_v43 = vld [vmem:[%s2328_s17 + $0x38] sm:$0xff]  ;;  %s2830_s14 = scalar_lea.vmem [#allocation7], %s1668_s29 }
  0x60   : > { %658 = vmatpush1.bf16.msra.mxu0 %v1858_v8  ;;  %v425_v41 = vpack.c.bf16 %v2362_v40, %v2359_v39  ;;  %v426_v44 = vpack.c.bf16 %v2371_v43, %v2368_v42  ;;  %v2377_v45 = vld [vmem:[%s2328_s17 + $0x40] sm:$0xff]  ;;  %v2380_v46 = vld [vmem:[%s2328_s17 + $0x48] sm:$0xff]  ;;  %v2386_v48 = vld [vmem:[%s2328_s17 + $0x50] sm:$0xff] }
  0x61   : > { %659 = vmatprep.subr.bf16.mxu0 %v1859_v9  ;;  %470 = vperm.xlu0 %1845, %v395_v19   ;;  %v427_v47 = vpack.c.bf16 %v2380_v46, %v2377_v45  ;;  %v2389_v49 = vld [vmem:[%s2328_s17 + $0x58] sm:$0xff]  ;;  %v2395_v51 = vld [vmem:[%s2328_s17 + $0x60] sm:$0xff]  ;;  %v2398_v52 = vld [vmem:[%s2328_s17 + $0x68] sm:$0xff] }
  0x62   : > { %475 = vperm.xlu1 %1846, %v396_v20   ;;  %v428_v50 = vpack.c.bf16 %v2389_v49, %v2386_v48  ;;  %v429_v53 = vpack.c.bf16 %v2398_v52, %v2395_v51  ;;  %v2404_v54 = vld [vmem:[%s2328_s17 + $0x70] sm:$0xff]  ;;  %v2407_v55 = vld [vmem:[%s2328_s17 + $0x78] sm:$0xff]  ;;  %v1871_v57 = vld [vmem:[#allocation5 + $0x40] sm:$0xff]  }
  0x63   : > { %v430_v56 = vpack.c.bf16 %v2407_v55, %v2404_v54  ;;  %v1872_v58 = vld [vmem:[#allocation5] sm:$0xff]   ;;  %1714 = vmatprep.subr.bf16.mxu1 %v1871_v57  ;;  %v1873_v59 = vld [vmem:[#allocation5 + $0x48] sm:$0xff]   ;;  %v1876_v62 = vld [vmem:[#allocation5 + $0x10] sm:$0xff]  }
  0x64   : > { %660 = vmatpush1.bf16.msra.mxu0 %v1861_v10  ;;  %1715 = vmatpush3.bf16.msra.mxu1 %v1872_v58  ;;  %v1874_v60 = vld [vmem:[#allocation5 + $0x8] sm:$0xff]   ;;  %v1877_v63 = vld [vmem:[#allocation5 + $0x58] sm:$0xff]   ;;  %v1879_v1 = vld [vmem:[#allocation5 + $0x60] sm:$0xff]  }
  0x65   : > { %661 = vmatprep.subr.bf16.mxu0 %v1862_v12  ;;  %480 = vperm.xlu0 %1845, %v397_v22   ;;  %v1880_v2 = vld [vmem:[#allocation5 + $0x20] sm:$0xff]   ;;  %v1881_v3 = vld [vmem:[#allocation5 + $0x68] sm:$0xff]   ;;  %v1883_v5 = vld [vmem:[#allocation5 + $0x70] sm:$0xff]  }
  0x66   : > { %485 = vperm.xlu1 %1846, %v398_v23   ;;  %1716 = vmatprep.subr.bf16.mxu1 %v1873_v59  ;;  %v1882_v4 = vld [vmem:[#allocation5 + $0x28] sm:$0xff]   ;;  %v1884_v6 = vld [vmem:[#allocation5 + $0x30] sm:$0xff]   ;;  %v1885_v7 = vld [vmem:[#allocation5 + $0x78] sm:$0xff]  }
  0x67   : > { %v1886_v8 = vld [vmem:[#allocation5 + $0x38] sm:$0xff]   ;;  %v2414_v9 = vld [vmem:[%s2953_s7] ss:$0 sm:$0xff] }
  0x68   : > { %662 = vmatpush1.bf16.msra.mxu0 %v1864_v16  ;;  %1717 = vmatpush3.bf16.msra.mxu1 %v1874_v60  ;;  %v2419_v10 = vld [vmem:[%s2954_s8] ss:$0 sm:$0xff]  ;;  %v1319_v11 = vsub.f32 %v2414_v9, %v2333_v25  ;;  %v1321_v12 = vsub.f32 %v2414_v9, %v2346_v32  ;;  %v1320_v13 = vsub.f32 %v2414_v9, %v2336_v26 }
  0x69   : > { %663 = vmatprep.subr.bf16.mxu0 %v1865_v17  ;;  %490 = vperm.xlu0 %1845, %v399_v27   ;;  %v1322_v14 = vsub.f32 %v2414_v9, %v2349_v33  ;;  %v1323_v15 = vsub.f32 %v2414_v9, %v2359_v39  ;;  %v1325_v16 = vsub.f32 %v2414_v9, %v2368_v42 }
  0x6a   : > { %495 = vperm.xlu1 %1846, %v400_v28   ;;  %1718 = vmatprep.subr.bf16.mxu1 %v1875_v61  ;;  %v2434_v17 = vmul.f32 %v2419_v10, %v1319_v11  ;;  %v2440_v19 = vmul.f32 %v2419_v10, %v1320_v13  ;;  %v1327_v28 = vsub.f32 %v2414_v9, %v2377_v45 }
  0x6b   : > { %v2443_v20 = vmul.f32 %v2419_v10, %v1323_v15  ;;  %v2450_v23 = vmul.f32 %v2419_v10, %v1322_v14  ;;  %v2455_v25 = vmul.f32 %v2419_v10, %v1325_v16 }
  0x6c   : > { %664 = vmatpush1.bf16.msra.mxu0 %v1867_v18  ;;  %1719 = vmatpush3.bf16.msra.mxu1 %v1876_v62  ;;  %v2437_v18 = vmul.f32 %v2419_v10, %v1321_v12  ;;  %v1359_v22 = vmul.f32 %v2440_v19, %v2440_v19  ;;  %v2473_v33 = vmul.f32 %v2419_v10, %v1327_v28  ;;  %v764_v62 = vld [vmem:[%s2950_s4] sm:$0x3] }
  0x6d   : > { %665 = vmatprep.subr.bf16.mxu0 %v1868_v21  ;;  %500 = vperm.xlu0 %1845, %v401_v30   ;;  %v1358_v21 = vmul.f32 %v2434_v17, %v2434_v17  ;;  %v1362_v27 = vmul.f32 %v2443_v20, %v2443_v20  ;;  %v1364_v32 = vmul.f32 %v2455_v25, %v2455_v25 }
  0x6e   : > { %505 = vperm.xlu1 %1846, %v402_v31   ;;  %1720 = vmatprep.subr.bf16.mxu1 %v1877_v63  ;;  %v1360_v26 = vmul.f32 %v2437_v18, %v2437_v18  ;;  %v1326_v31 = vsub.f32 %v2414_v9, %v2371_v43  ;;  %v1366_v39 = vmul.f32 %v2473_v33, %v2473_v33 }
  0x70   : > { %666 = vmatpush1.bf16.msra.mxu0 %v1870_v24  ;;  %v1324_v24 = vsub.f32 %v2414_v9, %v2362_v40 }
  0x71   : > { %510 = vperm.xlu0 %1845, %v403_v34   ;;  %v1329_v34 = vsub.f32 %v2414_v9, %v2386_v48 }
  0x72   : > { %515 = vperm.xlu1 %1846, %v404_v36   ;;  %v2466_v30 = vmul.f32 %v2419_v10, %v1324_v24 }
  0x73   : > { %684 = vmatmul.mubr.bf16.vlgmr.msra.gmra.mrb[0].mxu0 %v423_v29  ;;  %v1361_v29 = vmul.f32 %v2450_v23, %v2450_v23  ;;  %v2487_v40 = vmul.f32 %v2419_v10, %v1329_v34 }
  0x74   : > { %693 = vmatprep.mubr.bf16.mxu0 %v2133_v0  ;;  %v1363_v36 = vmul.f32 %v2466_v30, %v2466_v30 }
  0x75   : > { %520 = vperm.xlu0 %1845, %v405_v37   ;;  %v2480_v37 = vmul.f32 %v2419_v10, %v1326_v31 }
  0x76   : > { %525 = vperm.xlu1 %1846, %v406_v38   ;;  %v1328_v38 = vsub.f32 %v2414_v9, %v2380_v46  ;;  %v1368_v46 = vmul.f32 %v2487_v40, %v2487_v40 }
  0x77   : > { %v1365_v43 = vmul.f32 %v2480_v37, %v2480_v37 }
  0x78   : > { %v2496_v45 = vmul.f32 %v2419_v10, %v1328_v38 }
  0x7b   : > { %694 = vmatmul.mubr.bf16.gmra.mrb[4].mxu0 %v424_v35  ;;  %v529_v35 = vlaneseq }
  0x7c   : > { %703 = vmatprep.mubr.bf16.mxu0 %v2133_v0 }
  0x7d   : > { %v530_v42 = vshrl.u32 %v529_v35, 7 }
  0x7f   : > { %v531_v48 = vsub.s32 0, %v530_v42 }
  0x83   : > { %704 = vmatmul.mubr.bf16.gmra.mrb[8].mxu0 %v425_v41  ;;  %v1331_v41 = vsub.f32 %v2414_v9, %v2395_v51 }
  0x84   : > { %713 = vmatprep.mubr.bf16.mxu0 %v2133_v0 }
  0x8b   : > { %714 = vmatmul.mubr.bf16.gmra.mrb[12].mxu0 %v426_v44  ;;  %v1330_v44 = vsub.f32 %v2414_v9, %v2389_v49  ;;  %v1367_v49 = vmul.f32 %v2496_v45, %v2496_v45 }
  0x8c   : > { %723 = vmatprep.mubr.bf16.mxu0 %v2133_v0 }
  0x8d   : > { %v2509_v51 = vmul.f32 %v2419_v10, %v1330_v44 }
  0x8f   : > { %v1369_v59 = vmul.f32 %v2509_v51, %v2509_v51 }
  0x93   : > { %724 = vmatmul.mubr.bf16.gmra.mrb[16].mxu0 %v427_v47  ;;  %v2501_v47 = vmul.f32 %v2419_v10, %v1331_v41 }
  0x94   : > { %733 = vmatprep.mubr.bf16.mxu0 %v2133_v0  ;;  %1374 = vadd.xlane.f32.xlu0 %v1358_v21 }
  0x98   : > { %1378 = vadd.xlane.f32.xlu0 %v1360_v26 }
  0x9a   : > { %1376 = vadd.xlane.f32.xlu1 %v1359_v22 }
  0x9b   : > { %734 = vmatmul.mubr.bf16.gmra.mrb[20].mxu0 %v428_v50  ;;  %v447_v50 = vld [vmem:[%s2948_s2] sm:$0x3] }
  0x9c   : > { %743 = vmatprep.mubr.bf16.mxu0 %v2133_v0  ;;  %1380 = vadd.xlane.f32.xlu0 %v1361_v29  ;;  %v2513_v57 = vrot.slane %v447_v50, %v531_v48 }
  0x9e   : > { %1382 = vadd.xlane.f32.xlu1 %v1362_v27 }
  0xa0   : > { %1384 = vadd.xlane.f32.xlu0 %v1363_v36 }
  0xa2   : > { %1386 = vadd.xlane.f32.xlu1 %v1364_v32 }
  0xa3   : > { %744 = vmatmul.mubr.bf16.gmra.mrb[24].mxu0 %v429_v53  ;;  %v1370_v53 = vmul.f32 %v2501_v47, %v2501_v47 }
  0xa4   : > { %753 = vmatprep.mubr.bf16.mxu0 %v2133_v0  ;;  %v1878_v0 = vld [vmem:[#allocation5 + $0x18] sm:$0xff]   ;;  %1388 = vadd.xlane.f32.xlu0 %v1365_v43 }
  0xa5   : > { %1721 = vmatpush3.bf16.msra.mxu1 %v1878_v0 }
  0xa6   : > { %1722 = vmatprep.subr.bf16.mxu1 %v1879_v1  ;;  %1390 = vadd.xlane.f32.xlu1 %v1366_v39 }
  0xa8   : > { %1392 = vadd.xlane.f32.xlu0 %v1367_v49 }
  0xa9   : > { %1723 = vmatpush3.bf16.msra.mxu1 %v1880_v2 }
  0xaa   : > { %1724 = vmatprep.subr.bf16.mxu1 %v1881_v3  ;;  %1394 = vadd.xlane.f32.xlu1 %v1368_v46 }
  0xab   : > { %754 = vmatmul.mubr.bf16.gmra.mrb[28].mxu0 %v430_v56  ;;  %v535_v56 = vsub.s32 1, %v530_v42 }
  0xac   : > { %1396 = vadd.xlane.f32.xlu0 %v1369_v59 }
  0xad   : > { %1725 = vmatpush3.bf16.msra.mxu1 %v1882_v4  ;;  %v2517_v60 = vrot.slane %v447_v50, %v535_v56  ;;  %v2525_v4 = vrot.slane %v764_v62, %v531_v48  ;;  %v2528_v11 = vrot.slane %v764_v62, %v535_v56 }
  0xae   : > { %1726 = vmatprep.subr.bf16.mxu1 %v1883_v5  ;;  %1398 = vadd.xlane.f32.xlu1 %v1370_v53 }
  0xb1   : > { %1727 = vmatpush3.bf16.msra.mxu1 %v1884_v6 }
  0xb2   : > { %1728 = vmatprep.subr.bf16.mxu1 %v1885_v7 }
  0xb5   : > { %1729 = vmatpush3.bf16.msra.mxu1 %v1886_v8 }
  0xd8   : > { %v451_v58 = vpop.permute.xlu0 %450 }
  0xd9   : > { %v539_v61 = vmul.f32 %v2513_v57, %v451_v58  ;;  %v540_v63 = vmul.f32 %v2517_v60, %v451_v58  ;;  %v461_v7 = vpop.permute.xlu1 %460 }
  0xda   : > { %v543_v16 = vmul.f32 %v2513_v57, %v461_v7  ;;  %v544_v28 = vmul.f32 %v2517_v60, %v461_v7 }
  0xdc   : > { %v456_v0 = vpop.permute.xlu0 %455 }
  0xdd   : > { %v541_v2 = vmul.f32 %v2513_v57, %v456_v0  ;;  %v542_v6 = vmul.f32 %v2517_v60, %v456_v0  ;;  %v466_v29 = vpop.permute.xlu1 %465 }
  0xde   : > { %v545_v34 = vmul.f32 %v2513_v57, %v466_v29  ;;  %v546_v39 = vmul.f32 %v2517_v60, %v466_v29 }
  0xe0   : > { %v471_v59 = vpop.permute.xlu0 %470 }
  0xe1   : > { %v547_v0 = vmul.f32 %v2513_v57, %v471_v59 }
 0x146   : > { %v685_v1 = vpop.f32.mrb[0].mxu0 }
 0x147   : > { %v686_v3 = vadd.f32 %v685_v1, %v539_v61  ;;  %v687_v5 = vpop.f32.mrb[1].mxu0 }
 0x148   : > { %v688_v8 = vadd.f32 %v687_v5, %v540_v63  ;;  %v689_v12 = vpop.f32.mrb[2].mxu0  ;;  %v476_v5 = vpop.permute.xlu1 %475 }
 0x149   : > { %v690_v13 = vadd.f32 %v689_v12, %v541_v2  ;;  %v691_v14 = vpop.f32.mrb[3].mxu0  ;;  %v776_v21 = vadd.f32 %v2525_v4, %v686_v3  ;;  %v548_v3 = vmul.f32 %v2517_v60, %v471_v59  ;;  %v549_v12 = vmul.f32 %v2513_v57, %v476_v5 }
 0x14a   : > { %v692_v15 = vadd.f32 %v691_v14, %v542_v6  ;;  %v777_v24 = vadd.f32 %v2528_v11, %v688_v8 }
 0x14b   : > { %v778_v22 = vadd.f32 %v2525_v4, %v690_v13 }
 0x14c   : > { %v779_v26 = vadd.f32 %v2528_v11, %v692_v15 }
 0x14d   : > { %v2535_v27 = vpack.c.bf16 %v778_v22, %v776_v21 }
 0x14e   : > { %v2538_v31 = vpack.c.bf16 %v779_v26, %v777_v24  ;;  %v695_v32 = vpop.f32.mrb[4].mxu0 }
 0x14f   : > { %v696_v35 = vadd.f32 %v695_v32, %v543_v16  ;;  %v697_v36 = vpop.f32.mrb[5].mxu0  ;;  %v840_v38 = vmul.bf16 1027030327, %v2535_v27  ;;  %v550_v16 = vmul.f32 %v2517_v60, %v476_v5 }
 0x150   : > { %v698_v41 = vadd.f32 %v697_v36, %v544_v28  ;;  %v699_v42 = vpop.f32.mrb[6].mxu0  ;;  %v841_v43 = vmul.bf16 1027030327, %v2538_v31 }
 0x151   : > { %v700_v44 = vadd.f32 %v699_v42, %v545_v34  ;;  %v701_v46 = vpop.f32.mrb[7].mxu0  ;;  %v856_v48 = vmul.bf16 %v840_v38, %v2535_v27  ;;  %v780_v53 = vadd.f32 %v2525_v4, %v696_v35  ;;  %v481_v35 = vpop.permute.xlu0 %480 }
 0x152   : > { %v702_v50 = vadd.f32 %v701_v46, %v546_v39  ;;  %v857_v49 = vmul.bf16 %v841_v43, %v2538_v31  ;;  %v781_v61 = vadd.f32 %v2528_v11, %v698_v41 }
 0x153   : > { %v782_v56 = vadd.f32 %v2525_v4, %v700_v44  ;;  %v872_v58 = vmul.bf16 %v856_v48, %v2535_v27  ;;  %v551_v44 = vmul.f32 %v2513_v57, %v481_v35 }
 0x154   : > { %v783_v62 = vadd.f32 %v2528_v11, %v702_v50  ;;  %v873_v63 = vmul.bf16 %v857_v49, %v2538_v31  ;;  %v552_v50 = vmul.f32 %v2517_v60, %v481_v35  ;;  %v486_v49 = vpop.permute.xlu1 %485 }
 0x155   : > { %v2553_v1 = vpack.c.bf16 %v782_v56, %v780_v53  ;;  %v888_v2 = vadd.bf16 %v872_v58, %v2535_v27  ;;  %v553_v59 = vmul.f32 %v2513_v57, %v486_v49 }
 0x156   : > { %v2557_v6 = vpack.c.bf16 %v783_v62, %v781_v61  ;;  %v705_v7 = vpop.f32.mrb[8].mxu0  ;;  %v889_v8 = vadd.bf16 %v873_v63, %v2538_v31 }
 0x157   : > { %v706_v13 = vadd.f32 %v705_v7, %v547_v0  ;;  %v707_v14 = vpop.f32.mrb[9].mxu0  ;;  %v904_v15 = vmul.bf16 1061961548, %v888_v2  ;;  %v842_v34 = vmul.bf16 1027030327, %v2553_v1  ;;  %v554_v2 = vmul.f32 %v2517_v60, %v486_v49 }
 0x158   : > { %v708_v21 = vadd.f32 %v707_v14, %v548_v3  ;;  %v709_v22 = vpop.f32.mrb[10].mxu0  ;;  %v905_v24 = vmul.bf16 1061961548, %v889_v8  ;;  %v843_v29 = vmul.bf16 1027030327, %v2557_v6 }
 0x159   : > { %v710_v26 = vadd.f32 %v709_v22, %v549_v12  ;;  %v711_v28 = vpop.f32.mrb[11].mxu0  ;;  %1887 = vtanh.bf16 %v904_v15  ;;  %v784_v36 = vadd.f32 %v2525_v4, %v706_v13  ;;  %v858_v43 = vmul.bf16 %v842_v34, %v2553_v1  ;;  %v491_v12 = vpop.permute.xlu0 %490 }
 0x15a   : > { %v712_v32 = vadd.f32 %v711_v28, %v550_v16  ;;  %1889 = vtanh.bf16 %v905_v24  ;;  %v859_v39 = vmul.bf16 %v843_v29, %v2557_v6  ;;  %v785_v41 = vadd.f32 %v2528_v11, %v708_v21 }
 0x15b   : > { %v786_v38 = vadd.f32 %v2525_v4, %v710_v26  ;;  %v874_v58 = vmul.bf16 %v858_v43, %v2553_v1  ;;  %v555_v21 = vmul.f32 %v2513_v57, %v491_v12 }
 0x15c   : > { %v787_v42 = vadd.f32 %v2528_v11, %v712_v32  ;;  %v875_v48 = vmul.bf16 %v859_v39, %v2557_v6 }
 0x15d   : > { %v2571_v46 = vpack.c.bf16 %v786_v38, %v784_v36  ;;  %v890_v7 = vadd.bf16 %v874_v58, %v2553_v1 }
 0x15e   : > { %v2575_v53 = vpack.c.bf16 %v787_v42, %v785_v41  ;;  %v715_v56 = vpop.f32.mrb[12].mxu0  ;;  %v891_v63 = vadd.bf16 %v875_v48, %v2557_v6  ;;  %v556_v41 = vmul.f32 %v2517_v60, %v491_v12  ;;  %v496_v48 = vpop.permute.xlu1 %495 }
 0x15f   : > { %v716_v61 = vadd.f32 %v715_v56, %v551_v44  ;;  %v717_v62 = vpop.f32.mrb[13].mxu0  ;;  %v844_v0 = vmul.bf16 1027030327, %v2571_v46  ;;  %v906_v24 = vmul.bf16 1061961548, %v890_v7 }
 0x160   : > { %v718_v3 = vadd.f32 %v717_v62, %v552_v50  ;;  %v719_v5 = vpop.f32.mrb[14].mxu0  ;;  %v845_v8 = vmul.bf16 1027030327, %v2575_v53  ;;  %v907_v15 = vmul.bf16 1061961548, %v891_v63 }
 0x161   : > { %v720_v13 = vadd.f32 %v719_v5, %v553_v59  ;;  %v721_v14 = vpop.f32.mrb[15].mxu0  ;;  %v860_v16 = vmul.bf16 %v844_v0, %v2571_v46  ;;  %v788_v28 = vadd.f32 %v2525_v4, %v716_v61  ;;  %v825_v56 = vmul.bf16 1056980736, %v2538_v31 }
 0x162   : > { %v722_v22 = vadd.f32 %v721_v14, %v554_v2  ;;  %v861_v26 = vmul.bf16 %v845_v8, %v2575_v53  ;;  %1891 = vtanh.bf16 %v907_v15  ;;  %v789_v35 = vadd.f32 %v2528_v11, %v718_v3 }
 0x163   : > { %v790_v29 = vadd.f32 %v2525_v4, %v720_v13  ;;  %v876_v32 = vmul.bf16 %v860_v16, %v2571_v46  ;;  %1893 = vtanh.bf16 %v906_v24  ;;  %v557_v61 = vmul.f32 %v2513_v57, %v496_v48  ;;  %v501_v16 = vpop.permute.xlu0 %500 }
 0x164   : > { %v1888_v34 = vpop.eup %1887  ;;  %v791_v36 = vadd.f32 %v2528_v11, %v722_v22  ;;  %v877_v38 = vmul.bf16 %v861_v26, %v2575_v53  ;;  %v824_v0 = vmul.bf16 1056980736, %v2535_v27  ;;  %v558_v3 = vmul.f32 %v2517_v60, %v496_v48 }
 0x165   : > { %v1890_v39 = vpop.eup %1889  ;;  %v2594_v42 = vpack.c.bf16 %v790_v29, %v788_v28  ;;  %v936_v43 = vadd.bf16 1065369472, %v1888_v34  ;;  %v892_v44 = vadd.bf16 %v876_v32, %v2571_v46  ;;  %v559_v34 = vmul.f32 %v2513_v57, %v501_v16 }
 0x166   : > { %v2597_v50 = vpack.c.bf16 %v791_v36, %v789_v35  ;;  %v725_v49 = vpop.f32.mrb[16].mxu0  ;;  %v937_v58 = vadd.bf16 1065369472, %v1890_v39  ;;  %v893_v59 = vadd.bf16 %v877_v38, %v2575_v53  ;;  %v560_v35 = vmul.f32 %v2517_v60, %v501_v16  ;;  %v506_v36 = vpop.permute.xlu1 %505 }
 0x167   : > { %v726_v62 = vadd.f32 %v725_v49, %v555_v21  ;;  %v727_v63 = vpop.f32.mrb[17].mxu0  ;;  %v908_v2 = vmul.bf16 1061961548, %v892_v44  ;;  %v952_v15 = vmul.bf16 %v936_v43, %v824_v0  ;;  %v846_v21 = vmul.bf16 1027030327, %v2594_v42 }
 0x168   : > { %v728_v5 = vadd.f32 %v727_v63, %v556_v41  ;;  %v729_v7 = vpop.f32.mrb[18].mxu0  ;;  %v953_v8 = vmul.bf16 %v937_v58, %v825_v56  ;;  %v909_v12 = vmul.bf16 1061961548, %v893_v59  ;;  %v847_v31 = vmul.bf16 1027030327, %v2597_v50 }
 0x169   : > { %v730_v13 = vadd.f32 %v729_v7, %v557_v61  ;;  %v731_v14 = vpop.f32.mrb[19].mxu0  ;;  %1895 = vtanh.bf16 %v908_v2  ;;  %v792_v27 = vadd.f32 %v2525_v4, %v726_v62  ;;  %v862_v32 = vmul.bf16 %v846_v21, %v2594_v42  ;;  %v511_v2 = vpop.permute.xlu0 %510 }
 0x16a   : > { %v732_v22 = vadd.f32 %v731_v14, %v558_v3  ;;  %1135 = vmatprep.mubr.bf16.mxu1 %v953_v8  ;;  %1897 = vtanh.bf16 %v909_v12  ;;  %v863_v26 = vmul.bf16 %v847_v31, %v2597_v50  ;;  %v793_v28 = vadd.f32 %v2528_v11, %v728_v5 }
 0x16b   : > { %v794_v24 = vadd.f32 %v2525_v4, %v730_v13  ;;  %1136 = vmatmul.mubr.bf16.vlgmr.msra.gmra.mrb[0].mxu1 %v952_v15  ;;  %v561_v43 = vmul.f32 %v2513_v57, %v506_v36  ;;  %v562_v44 = vmul.f32 %v2517_v60, %v506_v36  ;;  %v878_v56 = vmul.bf16 %v862_v32, %v2594_v42  ;;  %v516_v32 = vpop.permute.xlu1 %515 }
 0x16c   : > { %v795_v29 = vadd.f32 %v2528_v11, %v732_v22  ;;  %v879_v39 = vmul.bf16 %v863_v26, %v2597_v50  ;;  %v827_v62 = vmul.bf16 1056980736, %v2557_v6  ;;  %v826_v7 = vmul.bf16 1056980736, %v2553_v1 }
 0x16d   : > { %v2614_v38 = vpack.c.bf16 %v794_v24, %v792_v27  ;;  %v1892_v41 = vpop.eup %1891  ;;  %v894_v12 = vadd.bf16 %v878_v56, %v2594_v42  ;;  %v563_v13 = vmul.f32 %v2513_v57, %v511_v2  ;;  %v565_v56 = vmul.f32 %v2513_v57, %v516_v32 }
 0x16e   : > { %v2619_v48 = vpack.c.bf16 %v795_v29, %v793_v28  ;;  %v735_v49 = vpop.f32.mrb[20].mxu0  ;;  %v1894_v58 = vpop.eup %1893  ;;  %v939_v63 = vadd.bf16 1065369472, %v1892_v41  ;;  %v895_v0 = vadd.bf16 %v879_v39, %v2597_v50  ;;  %v564_v29 = vmul.f32 %v2517_v60, %v511_v2 }
 0x16f   : > { %v736_v59 = vadd.f32 %v735_v49, %v559_v34  ;;  %v737_v61 = vpop.f32.mrb[21].mxu0  ;;  %v938_v8 = vadd.bf16 1065369472, %v1894_v58  ;;  %v910_v27 = vmul.bf16 1061961548, %v894_v12  ;;  %v521_v49 = vpop.permute.xlu0 %520 }
 0x170   : > { %v738_v3 = vadd.f32 %v737_v61, %v560_v35  ;;  %v739_v5 = vpop.f32.mrb[22].mxu0  ;;  %v955_v31 = vmul.bf16 %v939_v63, %v827_v62  ;;  %v911_v16 = vmul.bf16 1061961548, %v895_v0  ;;  %v849_v1 = vmul.bf16 1027030327, %v2619_v48 }
 0x171   : > { %v740_v14 = vadd.f32 %v739_v5, %v561_v43  ;;  %v741_v15 = vpop.f32.mrb[23].mxu0  ;;  %v796_v22 = vadd.f32 %v2525_v4, %v736_v59  ;;  %v954_v21 = vmul.bf16 %v938_v8, %v826_v7  ;;  %v848_v26 = vmul.bf16 1027030327, %v2614_v38 }
 0x172   : > { %v742_v6 = vadd.f32 %v741_v15, %v562_v44  ;;  %1143 = vmatprep.mubr.bf16.mxu1 %v955_v31  ;;  %1899 = vtanh.bf16 %v911_v16  ;;  %v797_v34 = vadd.f32 %v2528_v11, %v738_v3  ;;  %v829_v41 = vmul.bf16 1056980736, %v2575_v53 }
 0x173   : > { %v798_v24 = vadd.f32 %v2525_v4, %v740_v14  ;;  %1144 = vmatmul.mubr.bf16.gmra.mrb[4].mxu1 %v954_v21  ;;  %1901 = vtanh.bf16 %v910_v27  ;;  %v865_v43 = vmul.bf16 %v849_v1, %v2619_v48  ;;  %v864_v44 = vmul.bf16 %v848_v26, %v2614_v38 }
 0x174   : > { %v1896_v28 = vpop.eup %1895  ;;  %v799_v35 = vadd.f32 %v2528_v11, %v742_v6  ;;  %v566_v63 = vmul.f32 %v2517_v60, %v516_v32  ;;  %v828_v12 = vmul.bf16 1056980736, %v2571_v46  ;;  %v567_v15 = vmul.f32 %v2513_v57, %v521_v49  ;;  %v526_v6 = vpop.permute.xlu1 %525 }
 0x175   : > { %v1898_v36 = vpop.eup %1897  ;;  %v2634_v39 = vpack.c.bf16 %v798_v24, %v796_v22  ;;  %v940_v62 = vadd.bf16 1065369472, %v1896_v28  ;;  %v881_v3 = vmul.bf16 %v865_v43, %v2619_v48  ;;  %v880_v53 = vmul.bf16 %v864_v44, %v2614_v38 }
 0x176   : > { %v2640_v58 = vpack.c.bf16 %v799_v35, %v797_v34  ;;  %v745_v59 = vpop.f32.mrb[24].mxu0  ;;  %v941_v61 = vadd.bf16 1065369472, %v1898_v36  ;;  %v568_v32 = vmul.f32 %v2517_v60, %v521_v49  ;;  %v830_v49 = vmul.bf16 1056980736, %v2594_v42 }
 0x177   : > { %v746_v0 = vadd.f32 %v745_v59, %v563_v13  ;;  %v747_v2 = vpop.f32.mrb[25].mxu0  ;;  %v897_v22 = vadd.bf16 %v881_v3, %v2619_v48  ;;  %v896_v13 = vadd.bf16 %v880_v53, %v2614_v38  ;;  %v956_v24 = vmul.bf16 %v940_v62, %v828_v12 }
 0x178   : > { %v748_v5 = vadd.f32 %v747_v2, %v564_v29  ;;  %v749_v7 = vpop.f32.mrb[26].mxu0  ;;  %v957_v8 = vmul.bf16 %v941_v61, %v829_v41  ;;  %v851_v14 = vmul.bf16 1027030327, %v2640_v58  ;;  %v850_v29 = vmul.bf16 1027030327, %v2634_v39 }
 0x179   : > { %v750_v31 = vadd.f32 %v749_v7, %v565_v56  ;;  %v751_v16 = vpop.f32.mrb[27].mxu0  ;;  %v800_v21 = vadd.f32 %v2525_v4, %v746_v0  ;;  %v913_v26 = vmul.bf16 1061961548, %v897_v22  ;;  %v912_v28 = vmul.bf16 1061961548, %v896_v13 }
 0x17a   : > { %v752_v27 = vadd.f32 %v751_v16, %v566_v63  ;;  %1151 = vmatprep.mubr.bf16.mxu1 %v957_v8  ;;  %v867_v1 = vmul.bf16 %v851_v14, %v2640_v58  ;;  %v801_v34 = vadd.f32 %v2528_v11, %v748_v5  ;;  %v569_v41 = vmul.f32 %v2513_v57, %v526_v6 }
 0x17b   : > { %v802_v46 = vadd.f32 %v2525_v4, %v750_v31  ;;  %1152 = vmatmul.mubr.bf16.gmra.mrb[8].mxu1 %v956_v24  ;;  %1903 = vtanh.bf16 %v913_v26  ;;  %v866_v44 = vmul.bf16 %v850_v29, %v2634_v39  ;;  %v831_v3 = vmul.bf16 1056980736, %v2597_v50 }
 0x17c   : > { %v803_v35 = vadd.f32 %v2528_v11, %v752_v27  ;;  %v883_v36 = vmul.bf16 %v867_v1, %v2640_v58  ;;  %1905 = vtanh.bf16 %v912_v28  ;;  %v570_v5 = vmul.f32 %v2517_v60, %v526_v6 }
 0x17d   : > { %v2659_v43 = vpack.c.bf16 %v802_v46, %v800_v21  ;;  %v1900_v56 = vpop.eup %1899  ;;  %v882_v53 = vmul.bf16 %v866_v44, %v2634_v39 }
 0x17e   : > { %v2662_v59 = vpack.c.bf16 %v803_v35, %v801_v34  ;;  %v755_v61 = vpop.f32.mrb[28].mxu0  ;;  %v899_v62 = vadd.bf16 %v883_v36, %v2640_v58  ;;  %v1902_v63 = vpop.eup %1901  ;;  %v943_v57 = vadd.bf16 1065369472, %v1900_v56 }
 0x17f   : > { %v756_v0 = vadd.f32 %v755_v61, %v567_v15  ;;  %v757_v2 = vpop.f32.mrb[29].mxu0  ;;  %v942_v12 = vadd.bf16 1065369472, %v1902_v63  ;;  %v898_v22 = vadd.bf16 %v882_v53, %v2634_v39  ;;  %v852_v1 = vmul.bf16 1027030327, %v2659_v43 }
 0x180   : > { %v758_v7 = vadd.f32 %v757_v2, %v568_v32  ;;  %v759_v8 = vpop.f32.mrb[30].mxu0  ;;  %v915_v14 = vmul.bf16 1061961548, %v899_v62  ;;  %v959_v42 = vmul.bf16 %v943_v57, %v831_v3  ;;  %v853_v60 = vmul.bf16 1027030327, %v2662_v59 }
 0x181   : > { %v760_v31 = vadd.f32 %v759_v8, %v569_v41  ;;  %v761_v16 = vpop.f32.mrb[31].mxu0  ;;  %v958_v21 = vmul.bf16 %v942_v12, %v830_v49  ;;  %v804_v15 = vadd.f32 %v2525_v4, %v756_v0  ;;  %v914_v27 = vmul.bf16 1061961548, %v898_v22 }
 0x182   : > { %v762_v13 = vadd.f32 %v761_v16, %v570_v5  ;;  %1907 = vtanh.bf16 %v915_v14  ;;  %1159 = vmatprep.mubr.bf16.mxu1 %v959_v42  ;;  %v805_v6 = vadd.f32 %v2528_v11, %v758_v7  ;;  %v869_v26 = vmul.bf16 %v853_v60, %v2662_v59 }
 0x183   : > { %v806_v50 = vadd.f32 %v2525_v4, %v760_v31  ;;  %1160 = vmatmul.mubr.bf16.gmra.mrb[12].mxu1 %v958_v21  ;;  %1909 = vtanh.bf16 %v914_v27  ;;  %v868_v29 = vmul.bf16 %v852_v1, %v2659_v43  ;;  %v833_v41 = vmul.bf16 1056980736, %v2619_v48 }
 0x184   : > { %v807_v24 = vadd.f32 %v2528_v11, %v762_v13  ;;  %v885_v4 = vmul.bf16 %v869_v26, %v2662_v59  ;;  %v832_v49 = vmul.bf16 1056980736, %v2614_v38  ;;  %v835_v12 = vmul.bf16 1056980736, %v2640_v58 }
 0x185   : > { %v2676_v46 = vpack.c.bf16 %v806_v50, %v804_v15  ;;  %v884_v35 = vmul.bf16 %v868_v29, %v2659_v43  ;;  %v834_v21 = vmul.bf16 1056980736, %v2634_v39  ;;  %v837_v60 = vmul.bf16 1056980736, %v2662_v59 }
 0x186   : > { %v823_v28 = vpack.c.bf16 %v807_v24, %v805_v6  ;;  %v1904_v34 = vpop.eup %1903  ;;  %v901_v56 = vadd.bf16 %v885_v4, %v2662_v59  ;;  %v836_v6 = vmul.bf16 1056980736, %v2659_v43  ;;  %v1332_v59 = vsub.f32 %v2414_v9, %v2398_v52 }
 0x187   : > { %v854_v32 = vmul.bf16 1027030327, %v2676_v46  ;;  %v1906_v11 = vpop.eup %1905  ;;  %v945_v44 = vadd.bf16 1065369472, %v1904_v34  ;;  %v900_v63 = vadd.bf16 %v884_v35, %v2659_v43 }
 0x188   : > { %v855_v36 = vmul.bf16 1027030327, %v823_v28  ;;  %v944_v62 = vadd.bf16 1065369472, %v1906_v11  ;;  %v917_v3 = vmul.bf16 1061961548, %v901_v56  ;;  %v2698_v43 = vmul.f32 %v2419_v10, %v1332_v59 }
 0x189   : > { %v870_v61 = vmul.bf16 %v854_v32, %v2676_v46  ;;  %v961_v2 = vmul.bf16 %v945_v44, %v833_v41  ;;  %v916_v5 = vmul.bf16 1061961548, %v900_v63  ;;  %v839_v32 = vmul.bf16 1056980736, %v823_v28 }
 0x18a   : > { %v871_v0 = vmul.bf16 %v855_v36, %v823_v28  ;;  %v960_v53 = vmul.bf16 %v944_v62, %v832_v49  ;;  %1911 = vtanh.bf16 %v917_v3  ;;  %v838_v36 = vmul.bf16 1056980736, %v2676_v46  ;;  %v2719_v49 = vld [vmem:[%s2952_s6] ss:$0 sm:$0xff] }
 0x18b   : > { %v886_v57 = vmul.bf16 %v870_v61, %v2676_v46  ;;  %1167 = vmatprep.mubr.bf16.mxu1 %v961_v2  ;;  %1913 = vtanh.bf16 %v916_v5  ;;  %v1333_v41 = vsub.f32 %v2414_v9, %v2404_v54 }
 0x18c   : > { %v887_v7 = vmul.bf16 %v871_v0, %v823_v28  ;;  %1168 = vmatmul.mubr.bf16.gmra.mrb[16].mxu1 %v960_v53 }
 0x18d   : > { %v1908_v8 = vpop.eup %1907  ;;  %v902_v48 = vadd.bf16 %v886_v57, %v2676_v46  ;;  %v2705_v44 = vmul.f32 %v2419_v10, %v1333_v41  ;;  %v1334_v46 = vsub.f32 %v2414_v9, %v2407_v55 }
 0x18e   : > { %v947_v38 = vadd.bf16 1065369472, %v1908_v8  ;;  %v903_v14 = vadd.bf16 %v887_v7, %v823_v28  ;;  %v1910_v16 = vpop.eup %1909  ;;  %v1371_v28 = vmul.f32 %v2698_v43, %v2698_v43 }
 0x18f   : > { %v918_v31 = vmul.bf16 1061961548, %v902_v48  ;;  %v946_v13 = vadd.bf16 1065369472, %v1910_v16  ;;  %v1372_v56 = vmul.f32 %v2705_v44, %v2705_v44  ;;  %v2712_v52 = vmul.f32 %v2419_v10, %v1334_v46 }
 0x190   : > { %v963_v42 = vmul.bf16 %v947_v38, %v835_v12  ;;  %v919_v22 = vmul.bf16 1061961548, %v903_v14  ;;  %1400 = vadd.xlane.f32.xlu0 %v1371_v28 }
 0x191   : > { %1915 = vtanh.bf16 %v918_v31  ;;  %v962_v15 = vmul.bf16 %v946_v13, %v834_v21  ;;  %1402 = vadd.xlane.f32.xlu1 %v1372_v56  ;;  %v1373_v54 = vmul.f32 %v2712_v52, %v2712_v52 }
 0x192   : > { %1175 = vmatprep.mubr.bf16.mxu1 %v963_v42  ;;  %1917 = vtanh.bf16 %v919_v22 }
 0x194   : > { %1176 = vmatmul.mubr.bf16.gmra.mrb[20].mxu1 %v962_v15  ;;  %1404 = vadd.xlane.f32.xlu0 %v1373_v54 }
 0x195   : > { %v1912_v50 = vpop.eup %1911 }
 0x196   : > { %v1914_v27 = vpop.eup %1913  ;;  %v949_v58 = vadd.bf16 1065369472, %v1912_v50 }
 0x197   : > { %v948_v24 = vadd.bf16 1065369472, %v1914_v27 }
 0x198   : > { %v965_v1 = vmul.bf16 %v949_v58, %v837_v60 }
 0x199   : > { %v964_v29 = vmul.bf16 %v948_v24, %v836_v6 }
 0x19a   : > { %1183 = vmatprep.mubr.bf16.mxu1 %v965_v1 }
 0x19c   : > { %v1916_v26 = vpop.eup %1915  ;;  %1184 = vmatmul.mubr.bf16.gmra.mrb[24].mxu1 %v964_v29 }
 0x19d   : > { %v1918_v4 = vpop.eup %1917  ;;  %v950_v35 = vadd.bf16 1065369472, %v1916_v26 }
 0x19e   : > { %v951_v34 = vadd.bf16 1065369472, %v1918_v4 }
 0x19f   : > { %v966_v11 = vmul.bf16 %v950_v35, %v838_v36 }
 0x1a0   : > { %v967_v39 = vmul.bf16 %v951_v34, %v839_v32 }
 0x1a2   : > { %1191 = vmatprep.mubr.bf16.mxu1 %v967_v39 }
 0x1a4   : > { %1192 = vmatmul.mubr.bf16.gmra.mrb[28].mxu1 %v966_v11 }
 0x23e   : > { %v1730_v61 = vpop.f32.mrb[0].mxu1 }
 0x23f   : > { %v1731_v62 = vpop.f32.mrb[1].mxu1 }
 0x240   : > { %v1732_v55 = vadd.f32 %v1731_v62, %v1730_v61  ;;  %v1733_v9 = vpop.f32.mrb[2].mxu1 }
 0x241   : > { %v1734_v63 = vpop.f32.mrb[3].mxu1 }
 0x242   : > { %v2722_v0 = vadd.f32 %v1732_v55, %v2719_v49  ;;  %v1735_v10 = vadd.f32 %v1734_v63, %v1733_v9 }
 0x244   : > { %v2725_v2 = vadd.f32 %v1735_v10, %v2719_v49  ;;  %v1200_v3 = vmul.f32 %v2722_v0, %v2722_v0 }
 0x246   : > { %1216 = vadd.xlane.f32.xlu1 %v1200_v3  ;;  %v1201_v57 = vmul.f32 %v2725_v2, %v2725_v2  ;;  %v1736_v53 = vpop.f32.mrb[4].mxu1 }
 0x247   : > { %v1737_v5 = vpop.f32.mrb[5].mxu1 }
 0x248   : > { %1218 = vadd.xlane.f32.xlu0 %v1201_v57  ;;  %v1738_v7 = vadd.f32 %v1737_v5, %v1736_v53  ;;  %v1739_v8 = vpop.f32.mrb[6].mxu1 }
 0x249   : > { %v1740_v48 = vpop.f32.mrb[7].mxu1 }
 0x24a   : > { %v2732_v12 = vadd.f32 %v1738_v7, %v2719_v49  ;;  %v1741_v38 = vadd.f32 %v1740_v48, %v1739_v8 }
 0x24c   : > { %v2735_v14 = vadd.f32 %v1741_v38, %v2719_v49  ;;  %v1202_v31 = vmul.f32 %v2732_v12, %v2732_v12 }
 0x24e   : > { %1220 = vadd.xlane.f32.xlu1 %v1202_v31  ;;  %v1742_v16 = vpop.f32.mrb[8].mxu1  ;;  %v1203_v42 = vmul.f32 %v2735_v14, %v2735_v14 }
 0x24f   : > { %v1743_v22 = vpop.f32.mrb[9].mxu1 }
 0x250   : > { %v1744_v13 = vadd.f32 %v1743_v22, %v1742_v16  ;;  %1222 = vadd.xlane.f32.xlu0 %v1203_v42  ;;  %v1745_v21 = vpop.f32.mrb[10].mxu1 }
 0x251   : > { %v1746_v15 = vpop.f32.mrb[11].mxu1 }
 0x252   : > { %v2742_v50 = vadd.f32 %v1744_v13, %v2719_v49  ;;  %v1747_v27 = vadd.f32 %v1746_v15, %v1745_v21 }
 0x254   : > { %v2745_v60 = vadd.f32 %v1747_v27, %v2719_v49  ;;  %v1204_v58 = vmul.f32 %v2742_v50, %v2742_v50 }
 0x256   : > { %1224 = vadd.xlane.f32.xlu1 %v1204_v58  ;;  %v1748_v6 = vpop.f32.mrb[12].mxu1  ;;  %v1205_v24 = vmul.f32 %v2745_v60, %v2745_v60 }
 0x257   : > { %v1749_v1 = vpop.f32.mrb[13].mxu1 }
 0x258   : > { %v1750_v26 = vadd.f32 %v1749_v1, %v1748_v6  ;;  %1226 = vadd.xlane.f32.xlu0 %v1205_v24  ;;  %v1751_v29 = vpop.f32.mrb[14].mxu1 }
 0x259   : > { %v1752_v4 = vpop.f32.mrb[15].mxu1 }
 0x25a   : > { %v2752_v32 = vadd.f32 %v1750_v26, %v2719_v49  ;;  %v1753_v34 = vadd.f32 %v1752_v4, %v1751_v29 }
 0x25c   : > { %v2755_v39 = vadd.f32 %v1753_v34, %v2719_v49  ;;  %v1206_v35 = vmul.f32 %v2752_v32, %v2752_v32 }
 0x25e   : > { %1228 = vadd.xlane.f32.xlu1 %v1206_v35  ;;  %v1207_v36 = vmul.f32 %v2755_v39, %v2755_v39 }
 0x25f   : > { %v1754_v11 = vpop.f32.mrb[16].mxu1 }
 0x260   : > { %1230 = vadd.xlane.f32.xlu0 %v1207_v36  ;;  %v1755_v59 = vpop.f32.mrb[17].mxu1 }
 0x261   : > { %v1756_v41 = vadd.f32 %v1755_v59, %v1754_v11  ;;  %v1757_v28 = vpop.f32.mrb[18].mxu1  ;;  %v1375_v59 = vpop.xlane.xlu0 %1374 }
 0x262   : > { %v1758_v46 = vpop.f32.mrb[19].mxu1  ;;  %1919 = vrsqrt.f32 %v1375_v59 }
 0x263   : > { %v2762_v56 = vadd.f32 %v1756_v41, %v2719_v49  ;;  %v1759_v54 = vadd.f32 %v1758_v46, %v1757_v28  ;;  %v1377_v28 = vpop.xlane.xlu1 %1376 }
 0x264   : > { %1921 = vrsqrt.f32 %v1377_v28 }
 0x265   : > { %v2765_v61 = vadd.f32 %v1759_v54, %v2719_v49  ;;  %v1208_v62 = vmul.f32 %v2762_v56, %v2762_v56  ;;  %v1379_v41 = vpop.xlane.xlu0 %1378 }
 0x266   : > { %1923 = vrsqrt.f32 %v1379_v41 }
 0x267   : > { %1232 = vadd.xlane.f32.xlu1 %v1208_v62  ;;  %v1760_v55 = vpop.f32.mrb[20].mxu1  ;;  %v1209_v9 = vmul.f32 %v2765_v61, %v2765_v61  ;;  %v1383_v54 = vpop.xlane.xlu1 %1382 }
 0x268   : > { %v1761_v63 = vpop.f32.mrb[21].mxu1 }
 0x269   : > { %v1762_v10 = vadd.f32 %v1761_v63, %v1760_v55  ;;  %1234 = vadd.xlane.f32.xlu0 %v1209_v9  ;;  %v1763_v3 = vpop.f32.mrb[22].mxu1  ;;  %v1381_v46 = vpop.xlane.xlu0 %1380 }
 0x26a   : > { %v1764_v57 = vpop.f32.mrb[23].mxu1  ;;  %1925 = vrsqrt.f32 %v1381_v46 }
 0x26b   : > { %v2772_v53 = vadd.f32 %v1762_v10, %v2719_v49  ;;  %v1765_v5 = vadd.f32 %v1764_v57, %v1763_v3  ;;  %v1387_v55 = vpop.xlane.xlu1 %1386 }
 0x26d   : > { %v2775_v7 = vadd.f32 %v1765_v5, %v2719_v49  ;;  %v1210_v8 = vmul.f32 %v2772_v53, %v2772_v53  ;;  %v1385_v62 = vpop.xlane.xlu0 %1384 }
 0x26f   : > { %1236 = vadd.xlane.f32.xlu1 %v1210_v8  ;;  %v1766_v48 = vpop.f32.mrb[24].mxu1  ;;  %v1211_v38 = vmul.f32 %v2775_v7, %v2775_v7  ;;  %v2801_v63 = vpop.xlane.xlu1 %1390 }
 0x270   : > { %v1767_v31 = vpop.f32.mrb[25].mxu1 }
 0x271   : > { %v1768_v16 = vadd.f32 %v1767_v31, %v1766_v48  ;;  %1238 = vadd.xlane.f32.xlu0 %v1211_v38  ;;  %v1769_v42 = vpop.f32.mrb[26].mxu1  ;;  %v1389_v9 = vpop.xlane.xlu0 %1388 }
 0x272   : > { %v1770_v22 = vpop.f32.mrb[27].mxu1  ;;  %v1920_v48 = vpop.eup %1919 }
 0x273   : > { %v2782_v13 = vadd.f32 %v1768_v16, %v2719_v49  ;;  %v1771_v21 = vadd.f32 %v1770_v22, %v1769_v42  ;;  %v2805_v10 = vpop.xlane.xlu1 %1394  ;;  %v1922_v31 = vpop.eup %1921  ;;  %v1422_v16 = vmul.f32 8.0, %v1920_v48 }
 0x274   : > { %v1423_v42 = vmul.f32 8.0, %v1922_v31 }
 0x275   : > { %v2785_v15 = vadd.f32 %v1771_v21, %v2719_v49  ;;  %v1212_v27 = vmul.f32 %v2782_v13, %v2782_v13 }
 0x277   : > { %1240 = vadd.xlane.f32.xlu1 %v1212_v27  ;;  %v1772_v58 = vpop.f32.mrb[28].mxu1  ;;  %v1213_v6 = vmul.f32 %v2785_v15, %v2785_v15  ;;  %v2809_v57 = vpop.xlane.xlu1 %1398  ;;  %v1438_v27 = vmin.f32 %v1422_v16, 1.0 }
 0x278   : > { %v1773_v24 = vpop.f32.mrb[29].mxu1 }
 0x279   : > { %v1774_v1 = vadd.f32 %v1773_v24, %v1772_v58  ;;  %1242 = vadd.xlane.f32.xlu0 %v1213_v6  ;;  %v1775_v26 = vpop.f32.mrb[30].mxu1  ;;  %v1439_v58 = vmin.f32 %v1423_v42, 1.0  ;;  %v1924_v6 = vpop.eup %1923 }
 0x27a   : > { %v1776_v29 = vpop.f32.mrb[31].mxu1  ;;  %v1926_v24 = vpop.eup %1925  ;;  %v1424_v59 = vmul.f32 8.0, %v1924_v6 }
 0x27b   : > { %v2792_v4 = vadd.f32 %v1774_v1, %v2719_v49  ;;  %v1777_v34 = vadd.f32 %v1776_v29, %v1775_v26  ;;  %v2813_v8 = vpop.xlane.xlu1 %1402  ;;  %v1983_v1 = vld [vmem:[%s2328_s17] sm:$0xff]  ;;  %v1984_v29 = vld [vmem:[%s2328_s17 + $0x8] sm:$0xff]  ;;  %v1425_v28 = vmul.f32 8.0, %v1926_v24 }
 0x27c   : > { %v1470_v26 = vmul.f32 -1.0, %v1983_v1 }
 0x27d   : > { %v2795_v35 = vadd.f32 %v1777_v34, %v2719_v49  ;;  %v1214_v36 = vmul.f32 %v2792_v4, %v2792_v4  ;;  %v2803_v49 = vpop.xlane.xlu0 %1392  ;;  %v1471_v34 = vmul.f32 -1.0, %v1984_v29 }
 0x27f   : > { %1244 = vadd.xlane.f32.xlu1 %v1214_v36  ;;  %v1215_v11 = vmul.f32 %v2795_v35, %v2795_v35  ;;  %v1454_v36 = vmul.f32 %v1438_v27, %v2434_v17  ;;  %v1440_v17 = vmin.f32 %v1424_v59, 1.0 }
 0x281   : > { %1246 = vadd.xlane.f32.xlu0 %v1215_v11  ;;  %v2807_v3 = vpop.xlane.xlu0 %1396  ;;  %v1455_v11 = vmul.f32 %v1439_v58, %v2440_v19 }
 0x283   : > { %v1487_v31 = vsub.f32 %v1455_v11, %v1471_v34  ;;  %v1986_v34 = vld [vmem:[%s2328_s17 + $0x18] sm:$0xff]  ;;  %v1456_v11 = vmul.f32 %v1440_v17, %v2437_v18 }
 0x285   : > { %v2811_v5 = vpop.xlane.xlu0 %1400  ;;  %v1503_v6 = vmul.f32 0.70710677, %v1487_v31 }
 0x289   : > { %v2815_v38 = vpop.xlane.xlu0 %1404 }
 0x2d3   : > { %v1217_v22 = vpop.xlane.xlu1 %1216 }
 0x2d4   : > { %1927 = vrsqrt.f32 %v1217_v22  ;;  %v1441_v22 = vmin.f32 %v1425_v28, 1.0 }
 0x2d5   : > { %1929 = vrsqrt.f32 %v1383_v54  ;;  %v1219_v21 = vpop.xlane.xlu0 %1218 }
 0x2d6   : > { %1931 = vrsqrt.f32 %v1219_v21 }
 0x2d7   : > { %1933 = vrsqrt.f32 %v1385_v62  ;;  %v1486_v62 = vsub.f32 %v1454_v36, %v1470_v26  ;;  %v1985_v26 = vld [vmem:[%s2328_s17 + $0x10] sm:$0xff]  ;;  %v1473_v36 = vmul.f32 -1.0, %v1986_v34 }
 0x2d8   : > { %v1472_v29 = vmul.f32 -1.0, %v1985_v26  ;;  %v1988_v26 = vld [vmem:[%s2328_s17 + $0x28] sm:$0xff] }
 0x2da   : > { %v1488_v31 = vsub.f32 %v1456_v11, %v1472_v29  ;;  %v1475_v29 = vmul.f32 -1.0, %v1988_v26 }
 0x2db   : > { %v1221_v41 = vpop.xlane.xlu1 %1220 }
 0x2dc   : > { %1935 = vrsqrt.f32 %v1221_v41 }
 0x2dd   : > { %1937 = vrsqrt.f32 %v1387_v55  ;;  %v1223_v54 = vpop.xlane.xlu0 %1222  ;;  %v1502_v55 = vmul.f32 0.70710677, %v1486_v62 }
 0x2de   : > { %v1928_v46 = vpop.eup %1927  ;;  %1939 = vrsqrt.f32 %v1223_v54 }
 0x2df   : > { %v1930_v48 = vpop.eup %1929  ;;  %v1264_v16 = vmul.f32 4.0, %v1928_v46  ;;  %1941 = vrsqrt.f32 %v1389_v9  ;;  %v1457_v9 = vmul.f32 %v1441_v22, %v2450_v23 }
 0x2e0   : > { %v1932_v42 = vpop.eup %1931  ;;  %v1426_v27 = vmul.f32 8.0, %v1930_v48 }
 0x2e1   : > { %v1280_v19 = vmin.f32 %v1264_v16, 1.0  ;;  %v1265_v21 = vmul.f32 4.0, %v1932_v42  ;;  %v1934_v58 = vpop.eup %1933 }
 0x2e2   : > { %v1427_v46 = vmul.f32 8.0, %v1934_v58  ;;  %v1442_v62 = vmin.f32 %v1426_v27, 1.0 }
 0x2e3   : > { %v1296_v24 = vmul.f32 %v1280_v19, %v2722_v0  ;;  %v1281_v1 = vmin.f32 %v1265_v21, 1.0  ;;  %v1225_v59 = vpop.xlane.xlu1 %1224  ;;  %v1987_v21 = vld [vmem:[%s2328_s17 + $0x20] sm:$0xff] }
 0x2e4   : > { %1943 = vrsqrt.f32 %v1225_v59  ;;  %v1443_v42 = vmin.f32 %v1427_v46, 1.0  ;;  %v1474_v27 = vmul.f32 -1.0, %v1987_v21  ;;  %v1458_v58 = vmul.f32 %v1442_v62, %v2443_v20 }
 0x2e5   : > { %v1518_v41 = vadd.f32 %v1502_v55, %v1296_v24  ;;  %v1297_v28 = vmul.f32 %v1281_v1, %v2725_v2  ;;  %v1227_v54 = vpop.xlane.xlu0 %1226  ;;  %v1489_v2 = vsub.f32 %v1457_v9, %v1473_v36  ;;  %v1504_v55 = vmul.f32 0.70710677, %v1488_v31 }
 0x2e6   : > { %v1936_v48 = vpop.eup %1935  ;;  %1945 = vrsqrt.f32 %v1227_v54  ;;  %v1490_v9 = vsub.f32 %v1458_v58, %v1474_v27 }
 0x2e7   : > { %1534 = vst [vmem:[%s2830_s14] sm:$0xff] %v1518_v41  ;;  %v1519_v0 = vadd.f32 %v1503_v6, %v1297_v28  ;;  %v1938_v18 = vpop.eup %1937  ;;  %1947 = vrsqrt.f32 %v2801_v63  ;;  %v1266_v23 = vmul.f32 4.0, %v1936_v48  ;;  %v1505_v34 = vmul.f32 0.70710677, %v1489_v2 }
 0x2e8   : > { %v1940_v16 = vpop.eup %1939  ;;  %1949 = vrsqrt.f32 %v2805_v10  ;;  %v1428_v6 = vmul.f32 8.0, %v1938_v18  ;;  %v1459_v10 = vmul.f32 %v1443_v42, %v2466_v30 }
 0x2e9   : > { %1535 = vst [vmem:[%s2830_s14 + $0x8] sm:$0xff] %v1519_v0  ;;  %v1282_v17 = vmin.f32 %v1266_v23, 1.0  ;;  %v1267_v22 = vmul.f32 4.0, %v1940_v16  ;;  %v1942_v19 = vpop.eup %1941  ;;  %1951 = vrsqrt.f32 %v2803_v49  ;;  %v1506_v23 = vmul.f32 0.70710677, %v1490_v9 }
 0x2ea   : > { %v1429_v36 = vmul.f32 8.0, %v1942_v19  ;;  %v1491_v30 = vsub.f32 %v1459_v10, %v1475_v29 }
 0x2eb   : > { %v1298_v63 = vmul.f32 %v1282_v17, %v2732_v12  ;;  %v1283_v24 = vmin.f32 %v1267_v22, 1.0  ;;  %v1229_v1 = vpop.xlane.xlu1 %1228  ;;  %v1444_v12 = vmin.f32 %v1428_v6, 1.0  ;;  %v1990_v22 = vld [vmem:[%s2328_s17 + $0x38] sm:$0xff] }
 0x2ec   : > { %1953 = vrsqrt.f32 %v1229_v1  ;;  %v1445_v48 = vmin.f32 %v1429_v36, 1.0  ;;  %v1477_v19 = vmul.f32 -1.0, %v1990_v22  ;;  %v1507_v21 = vmul.f32 0.70710677, %v1491_v30 }
 0x2ed   : > { %v1520_v11 = vadd.f32 %v1504_v55, %v1298_v63  ;;  %v1299_v20 = vmul.f32 %v1283_v24, %v2735_v14  ;;  %v1231_v59 = vpop.xlane.xlu0 %1230  ;;  %v1989_v14 = vld [vmem:[%s2328_s17 + $0x30] sm:$0xff]  ;;  %v1460_v16 = vmul.f32 %v1444_v12, %v2455_v25 }
 0x2ee   : > { %v1944_v49 = vpop.eup %1943  ;;  %1955 = vrsqrt.f32 %v1231_v59  ;;  %v1476_v18 = vmul.f32 -1.0, %v1989_v14  ;;  %v1461_v27 = vmul.f32 %v1445_v48, %v2480_v37 }
 0x2ef   : > { %1536 = vst [vmem:[%s2830_s14 + $0x10] sm:$0xff] %v1520_v11  ;;  %v1521_v41 = vadd.f32 %v1505_v34, %v1299_v20  ;;  %v1268_v28 = vmul.f32 4.0, %v1944_v49  ;;  %1957 = vrsqrt.f32 %v2807_v3  ;;  %v1991_v49 = vld [vmem:[%s2328_s17 + $0x40] sm:$0xff] }
 0x2f0   : > { %v1946_v46 = vpop.eup %1945  ;;  %1959 = vrsqrt.f32 %v2809_v57  ;;  %v1492_v25 = vsub.f32 %v1460_v16, %v1476_v18  ;;  %v1493_v57 = vsub.f32 %v1461_v27, %v1477_v19  ;;  %v1478_v9 = vmul.f32 -1.0, %v1991_v49  ;;  %v1995_v49 = vld [vmem:[%s2328_s17 + $0x60] sm:$0xff] }
 0x2f1   : > { %v1948_v54 = vpop.eup %1947  ;;  %1537 = vst [vmem:[%s2830_s14 + $0x18] sm:$0xff] %v1521_v41  ;;  %v1284_v62 = vmin.f32 %v1268_v28, 1.0  ;;  %v1269_v0 = vmul.f32 4.0, %v1946_v46 }
 0x2f2   : > { %v1950_v31 = vpop.eup %1949  ;;  %v1430_v3 = vmul.f32 8.0, %v1948_v54  ;;  %v1509_v41 = vmul.f32 0.70710677, %v1493_v57 }
 0x2f3   : > { %v1300_v2 = vmul.f32 %v1284_v62, %v2742_v50  ;;  %v1285_v42 = vmin.f32 %v1269_v0, 1.0  ;;  %v1952_v17 = vpop.eup %1951  ;;  %v1432_v12 = vmul.f32 8.0, %v1950_v31  ;;  %v1992_v62 = vld [vmem:[%s2328_s17 + $0x48] sm:$0xff] }
 0x2f4   : > { %v1233_v6 = vpop.xlane.xlu1 %1232  ;;  %v1431_v50 = vmul.f32 8.0, %v1952_v17  ;;  %v1446_v34 = vmin.f32 %v1430_v3, 1.0  ;;  %v1479_v0 = vmul.f32 -1.0, %v1992_v62 }
 0x2f5   : > { %v1522_v58 = vadd.f32 %v1506_v23, %v1300_v2  ;;  %v1301_v55 = vmul.f32 %v1285_v42, %v2745_v60  ;;  %1961 = vrsqrt.f32 %v1233_v6  ;;  %v1508_v60 = vmul.f32 0.70710677, %v1492_v25 }
 0x2f6   : > { %v1954_v63 = vpop.eup %1953  ;;  %v1235_v26 = vpop.xlane.xlu0 %1234  ;;  %v1447_v11 = vmin.f32 %v1431_v50, 1.0  ;;  %v1462_v28 = vmul.f32 %v1446_v34, %v2473_v33  ;;  %v1448_v33 = vmin.f32 %v1432_v12, 1.0 }
 0x2f7   : > { %1538 = vst [vmem:[%s2830_s14 + $0x20] sm:$0xff] %v1522_v58  ;;  %v1523_v24 = vadd.f32 %v1507_v21, %v1301_v55  ;;  %v1270_v1 = vmul.f32 4.0, %v1954_v63  ;;  %1963 = vrsqrt.f32 %v1235_v26  ;;  %v1994_v63 = vld [vmem:[%s2328_s17 + $0x58] sm:$0xff] }
 0x2f8   : > { %v1956_v29 = vpop.eup %1955  ;;  %1965 = vrsqrt.f32 %v2811_v5  ;;  %v1494_v23 = vsub.f32 %v1462_v28, %v1478_v9  ;;  %v1464_v3 = vmul.f32 %v1448_v33, %v2487_v40  ;;  %v1481_v25 = vmul.f32 -1.0, %v1994_v63 }
 0x2f9   : > { %1539 = vst [vmem:[%s2830_s14 + $0x28] sm:$0xff] %v1523_v24  ;;  %v1286_v37 = vmin.f32 %v1270_v1, 1.0  ;;  %v1271_v10 = vmul.f32 4.0, %v1956_v29  ;;  %v1958_v36 = vpop.eup %1957 }
 0x2fa   : > { %v1960_v48 = vpop.eup %1959  ;;  %v1433_v5 = vmul.f32 8.0, %v1958_v36  ;;  %v1510_v21 = vmul.f32 0.70710677, %v1494_v23 }
 0x2fb   : > { %v1302_v20 = vmul.f32 %v1286_v37, %v2752_v32  ;;  %v1287_v59 = vmin.f32 %v1271_v10, 1.0  ;;  %v1463_v32 = vmul.f32 %v1447_v11, %v2496_v45  ;;  %v1434_v27 = vmul.f32 8.0, %v1960_v48 }
 0x2fc   : > { %v1237_v30 = vpop.xlane.xlu1 %1236  ;;  %v1449_v2 = vmin.f32 %v1433_v5, 1.0 }
 0x2fd   : > { %v1524_v46 = vadd.f32 %v1508_v60, %v1302_v20  ;;  %v1303_v54 = vmul.f32 %v1287_v59, %v2755_v39  ;;  %1967 = vrsqrt.f32 %v1237_v30  ;;  %v1495_v42 = vsub.f32 %v1463_v32, %v1479_v0  ;;  %v1996_v30 = vld [vmem:[%s2328_s17 + $0x68] sm:$0xff] }
 0x2fe   : > { %1969 = vrsqrt.f32 %v2813_v8  ;;  %v1239_v18 = vpop.xlane.xlu0 %1238  ;;  %v1993_v8 = vld [vmem:[%s2328_s17 + $0x50] sm:$0xff]  ;;  %v1465_v50 = vmul.f32 %v1449_v2, %v2509_v51  ;;  %v1450_v34 = vmin.f32 %v1434_v27, 1.0  ;;  %v1483_v48 = vmul.f32 -1.0, %v1996_v30 }
 0x2ff   : > { %1540 = vst [vmem:[%s2830_s14 + $0x30] sm:$0xff] %v1524_v46  ;;  %v1525_v14 = vadd.f32 %v1509_v41, %v1303_v54  ;;  %v1962_v31 = vpop.eup %1961  ;;  %1971 = vrsqrt.f32 %v1239_v18  ;;  %v1480_v19 = vmul.f32 -1.0, %v1993_v8 }
 0x300   : > { %v1272_v39 = vmul.f32 4.0, %v1962_v31  ;;  %1973 = vrsqrt.f32 %v2815_v38  ;;  %v1511_v38 = vmul.f32 0.70710677, %v1495_v42  ;;  %v1497_v51 = vsub.f32 %v1465_v50, %v1481_v25 }
 0x301   : > { %1541 = vst [vmem:[%s2830_s14 + $0x38] sm:$0xff] %v1525_v14  ;;  %v1964_v16 = vpop.eup %1963  ;;  %v1496_v57 = vsub.f32 %v1464_v3, %v1480_v19  ;;  %v1466_v12 = vmul.f32 %v1450_v34, %v2501_v47  ;;  %v1998_v3 = vld [vmem:[%s2328_s17 + $0x78] sm:$0xff] }
 0x302   : > { %v1288_v17 = vmin.f32 %v1272_v39, 1.0  ;;  %v1273_v45 = vmul.f32 4.0, %v1964_v16  ;;  %v1966_v22 = vpop.eup %1965  ;;  %v1513_v5 = vmul.f32 0.70710677, %v1497_v51 }
 0x303   : > { %v1435_v24 = vmul.f32 8.0, %v1966_v22  ;;  %v1512_v9 = vmul.f32 0.70710677, %v1496_v57 }
 0x304   : > { %v1304_v58 = vmul.f32 %v1288_v17, %v2762_v56  ;;  %v1289_v55 = vmin.f32 %v1273_v45, 1.0  ;;  %v1241_v6 = vpop.xlane.xlu1 %1240  ;;  %v1997_v17 = vld [vmem:[%s2328_s17 + $0x70] sm:$0xff]  ;;  %s1564_s17 = sshll.u32 %s2830_s14, 4  ;;  %s2899_s17 = int_to_ptr.vmem [resolvable:$true] %s1564_s17 }
 0x305   : > { %1975 = vrsqrt.f32 %v1241_v6  ;;  %v1451_v60 = vmin.f32 %v1435_v24, 1.0  ;;  %v1484_v45 = vmul.f32 -1.0, %v1997_v17  ;;  %s2055_s11 = scalar_lea.vmem %s2899_s17, 2048  ;;  %p2062_p4 = scmp.lt.s32.totalorder %s2899_s17, %s2060_s18 }
 0x306   : > { %v1526_v1 = vadd.f32 %v1510_v21, %v1304_v58  ;;  %v1305_v26 = vmul.f32 %v1289_v55, %v2765_v61  ;;  %v1243_v29 = vpop.xlane.xlu0 %1242  ;;  %v1482_v61 = vmul.f32 -1.0, %v1995_v49  ;;  %v1485_v21 = vmul.f32 -1.0, %v1998_v3  ;;  %p2056_p10 = scmp.ne.s32.totalorder %s2899_s17, %s2055_s11  ;;  %p2063_p7 = scmp.lt.s32.totalorder %s2061_s27, %s2055_s11 }
 0x307   : > { %v1968_v40 = vpop.eup %1967  ;;  %1977 = vrsqrt.f32 %v1243_v29  ;;  %v1467_v62 = vmul.f32 %v1451_v60, %v2698_v43 }
 0x308   : > { %v1970_v56 = vpop.eup %1969  ;;  %1542 = vst [vmem:[%s2830_s14 + $0x40] sm:$0xff] %v1526_v1  ;;  %v1527_v37 = vadd.f32 %v1511_v38, %v1305_v26  ;;  %v1274_v10 = vmul.f32 4.0, %v1968_v40  ;;  %v1498_v31 = vsub.f32 %v1466_v12, %v1482_v61  ;;  %p2057_p2 = pnand %p2056_p10, %p2974_p1  ;;  %p2064_p8 = por %p2063_p7, %p2062_p4 }
 0x309   : > { %v1972_v36 = vpop.eup %1971  ;;  %v1436_v41 = vmul.f32 8.0, %v1970_v56  ;;  %v1499_v16 = vsub.f32 %v1467_v62, %v1483_v48 }
 0x30a   : > { %1543 = vst [vmem:[%s2830_s14 + $0x48] sm:$0xff] %v1527_v37  ;;  %v1290_v11 = vmin.f32 %v1274_v10, 1.0  ;;  %v1275_v20 = vmul.f32 4.0, %v1972_v36  ;;  %v1974_v59 = vpop.eup %1973  ;;  %v1514_v22 = vmul.f32 0.70710677, %v1498_v31  ;;  %p2058_p3 = pneg %p2057_p2 }
 0x30b   : > { %v1437_v0 = vmul.f32 8.0, %v1974_v59  ;;  %v1515_v27 = vmul.f32 0.70710677, %v1499_v16 }
 0x30c   : > { %v1306_v28 = vmul.f32 %v1290_v11, %v2772_v53  ;;  %v1291_v46 = vmin.f32 %v1275_v20, 1.0  ;;  %v1245_v54 = vpop.xlane.xlu1 %1244  ;;  %v1452_v53 = vmin.f32 %v1436_v41, 1.0  ;;  %p2065_p11 = pnand %p2064_p8, %p2058_p3 }
 0x30d   : > { %1979 = vrsqrt.f32 %v1245_v54  ;;  %v1453_v2 = vmin.f32 %v1437_v0, 1.0 }
 0x30e   : > { %v1528_v32 = vadd.f32 %v1512_v9, %v1306_v28  ;;  %v1307_v14 = vmul.f32 %v1291_v46, %v2775_v7  ;;  %v1247_v18 = vpop.xlane.xlu0 %1246  ;;  %v1468_v7 = vmul.f32 %v1452_v53, %v2705_v44 }
 0x30f   : > { %v1976_v47 = vpop.eup %1975  ;;  %1981 = vrsqrt.f32 %v1247_v18  ;;  %v1469_v58 = vmul.f32 %v1453_v2, %v2712_v52 }
 0x310   : > { %1544 = vst [vmem:[%s2830_s14 + $0x50] sm:$0xff] %v1528_v32  ;;  %v1529_v33 = vadd.f32 %v1513_v5, %v1307_v14  ;;  %v1276_v23 = vmul.f32 4.0, %v1976_v47  ;;  %v1500_v25 = vsub.f32 %v1468_v7, %v1484_v45 }
 0x311   : > { %v1978_v39 = vpop.eup %1977  ;;  %v1501_v24 = vsub.f32 %v1469_v58, %v1485_v21 }
 0x312   : > { %1545 = vst [vmem:[%s2830_s14 + $0x58] sm:$0xff] %v1529_v33  ;;  %v1292_v42 = vmin.f32 %v1276_v23, 1.0  ;;  %v1277_v43 = vmul.f32 4.0, %v1978_v39  ;;  %v1516_v26 = vmul.f32 0.70710677, %v1500_v25 }
 0x314   : > { %v1308_v8 = vmul.f32 %v1292_v42, %v2782_v13  ;;  %v1293_v19 = vmin.f32 %v1277_v43, 1.0 }
 0x316   : > { %v1530_v55 = vadd.f32 %v1514_v22, %v1308_v8  ;;  %v1309_v6 = vmul.f32 %v1293_v19, %v2785_v15  ;;  %v1517_v15 = vmul.f32 0.70710677, %v1501_v24 }
 0x317   : > { %v1980_v63 = vpop.eup %1979 }
 0x318   : > { %1546 = vst [vmem:[%s2830_s14 + $0x60] sm:$0xff] %v1530_v55  ;;  %v1531_v50 = vadd.f32 %v1515_v27, %v1309_v6  ;;  %v1278_v38 = vmul.f32 4.0, %v1980_v63 }
 0x319   : > { %v1982_v44 = vpop.eup %1981 }
 0x31a   : > { %1547 = vst [vmem:[%s2830_s14 + $0x68] sm:$0xff] %v1531_v50  ;;  %v1294_v13 = vmin.f32 %v1278_v38, 1.0  ;;  %v1279_v1 = vmul.f32 4.0, %v1982_v44 }
 0x31c   : > { %v1310_v52 = vmul.f32 %v1294_v13, %v2792_v4  ;;  %v1295_v29 = vmin.f32 %v1279_v1, 1.0 }
 0x31e   : > { %v1532_v40 = vadd.f32 %v1516_v26, %v1310_v52  ;;  %v1311_v57 = vmul.f32 %v1295_v29, %v2795_v35 }
 0x320   : > { %1548 = vst [vmem:[%s2830_s14 + $0x70] sm:$0xff] %v1532_v40  ;;  %v1533_v56 = vadd.f32 %v1517_v15, %v1311_v57 }
 0x322   : > { %1549 = vst [vmem:[%s2830_s14 + $0x78] sm:$0xff] %v1533_v56 }
 0x323   : > { %2068 = shalt.err (!%p2065_p11)
}
 0x324   : > { %s2069_s21 = scalar_lea.hbm %s2897_s23, 2048  ;;  %s2073_s28 = scalar_lea.hbm %s2955_s9, 4096 }
 0x325   : > { %p2070_p13 = scmp.ne.s32.totalorder %s2897_s23, %s2069_s21  ;;  %p2074_p6 = scmp.lt.u32.totalorder %s2897_s23, %s2955_s9 }
 0x326   : > { %p2075_p9 = scmp.lt.u32.totalorder %s2073_s28, %s2069_s21  ;;  %p2077_p10 = scmp.lt.u32.totalorder %s2069_s21, %s2897_s23 }
 0x327   : > { %p2071_p0 = pnand %p2070_p13, %p2974_p1 }
 0x328   : > { %p2076_p12 = por %p2075_p9, %p2074_p6 }
 0x329   : > { %p2072_p5 = pneg %p2071_p0 }
 0x32a   : > { %p2078_p2 = por %p2077_p10, %p2076_p12 }
 0x32c   : > { %p2079_p3 = pnand %p2078_p2, %p2072_p5 }
 0x32e   : > { %2082 = shalt.err (!%p2079_p3)
}
 0x32f   : > { %s2135_s16 = smov 128   ;;  %s2136_s22 = smov 8  }
 0x330   : > { %1786 = dma.vmem_to_hbm [thread:$0]  (%p2974_p1), %s2899_s17, 2048, %s2897_s23, %s2905_s13, %s2135_s16, %s2135_s16, %s2136_s22  }
 0x331 PF: > { %p1803_p4 = scmp.ge.s32.totalorder %s2125_s12, 2  ;;  %s1579_s25 = sand.u32 1, %s2113_s30  }
 0x332   : > { %p2975_p7 = scmp.ne.s32.totalorder %s2966_s20, 0  ;;  %s1580_s11 = scalar_lea.sflag [#allocation4], %s1579_s25 }
 0x334   : > { %p1796_p8 = pnand %p1803_p4, %p2975_p7 }
 0x336   : > { %2108 = dma.done.wait (!%p1796_p8), %s1580_s11, 2048  }
 0x337   : > { %2110 = vsyncadd (!%p1796_p8), %s1580_s11, 4294965248  ;;  %s2976_s12 = sld [smem:[#allocation12_spill]]  ;;  %s2977_s15 = sld [smem:[#allocation11_spill]] }
 0x338   : > { %s2978_s11 = sld [smem:[#allocation13_spill]]  ;;  %s2979_s30 = smov %s2117_s10 }
 0x33d   : > { %p21_p11 = scmp.ge.s32.totalorder %s2976_s12, 4   ;;  %s2980_s10 = smov %s2977_s15 }
 0x33f   :  { %23 = sbr.rel (!%p21_p11) target bundleno = 5 (0x5), region = 103 }
 0x346   :  { %1585 = vsyncpa [#allocation3], 1 }
 0x347   :  { %1587 = vsyncpa [#allocation3 + $0x1], 1 }
 0x348   :  { %1588 = vsyncpa [#allocation6], 1 }
 0x349   :  { %1589 = vsyncpa [#allocation4], 1 }
 0x34a   :  { %1591 = vsyncpa [#allocation4 + $0x1], 1 }

</bundles_post_ra>
